<compile_context>
chip_gen: v7x
topology: tpu7x:2x2x1
jax: 0.10.0
libtpu: 0.0.40
codegen_flags: <defaults>
</compile_context>

<pallas_src>
import functools

import numpy as np
import jax
import jax.numpy as jnp
from jax.experimental import pallas as pl
from jax.experimental.pallas import tpu as pltpu


# -----------------------------------------------------------------------------
# Anchor construction (plain Python / numpy glue, mirrors Assigner.__init__)
# -----------------------------------------------------------------------------
def _update_anchor(anchor, w, h):
    x1, y1, x2, y2 = anchor
    cx = (x1 + x2) / 2.0
    cy = (y1 + y2) / 2.0
    return [cx - w / 2.0, cy - h / 2.0, cx + w / 2.0, cy + h / 2.0]


def build_anchors(im_hw, anchor_num_per_level):
    im_h, im_w = im_hw
    scales = [(40.0, 40.0 * 1.27632319),
              (60.0, 60.0 * 1.27632319),
              (120.0, 120.0 * 1.27632319)]
    all_anchors = []
    for lvl, (m, n) in enumerate(anchor_num_per_level):
        unit_h = im_h / m
        unit_w = im_w / n
        anchors = [[unit_w * i, unit_h * j, unit_w * (i + 1), unit_h * (j + 1)]
                   for j in range(n) for i in range(m)]
        w, h = scales[lvl]
        anchors = [_update_anchor(a, w, h) for a in anchors]
        all_anchors += anchors
    return np.asarray(all_anchors, dtype=np.float32)  # (A, 4)


def _round_up(x, m):
    return ((x + m - 1) // m) * m


# -----------------------------------------------------------------------------
# Pallas kernel: processes B_BLK batch elements per grid step
# -----------------------------------------------------------------------------
def assigner_kernel(gt_ref, anc_ref, pos_ref, neg_ref, scr_ref,
                    *, n_anchors, topk, eps=1e-9):
    B, Mpad, _ = gt_ref.shape
    Apad = anc_ref.shape[1]
    M_out = pos_ref.shape[1]
    A_out = pos_ref.shape[2]

    gt = gt_ref[...]                                  # (B, Mpad, 4)
    gx1 = gt[:, :, 0:1]
    gy1 = gt[:, :, 1:2]
    gx2 = gt[:, :, 2:3]
    gy2 = gt[:, :, 3:4]                               # (B, Mpad, 1)

    anc = anc_ref[...]                                # (8, Apad) host-precomputed
    ax1 = anc[0:1, :].reshape(1, 1, Apad)
    ay1 = anc[1:2, :].reshape(1, 1, Apad)
    ax2 = anc[2:3, :].reshape(1, 1, Apad)
    ay2 = anc[3:4, :].reshape(1, 1, Apad)
    acx = anc[4:5, :].reshape(1, 1, Apad)
    acy = anc[5:6, :].reshape(1, 1, Apad)
    area2 = anc[6:7, :].reshape(1, 1, Apad)           # (1, 1, Apad)

    # ---- pairwise IoU  (calculate_batch_iou) --------------------------------
    x1 = jnp.maximum(gx1, ax1)
    y1 = jnp.maximum(gy1, ay1)
    x2 = jnp.minimum(gx2, ax2)
    y2 = jnp.minimum(gy2, ay2)
    overlap = jnp.maximum(x2 - x1, 0.0) * jnp.maximum(y2 - y1, 0.0)     # (B,M,A)
    area1 = jnp.maximum(gx2 - gx1, 0.0) * jnp.maximum(gy2 - gy1, 0.0)   # (B,M,1)
    union = area1 + area2 - overlap + eps
    # exact division (EUP reciprocal + refinement); approx recip can flip masks near thr
    iou = overlap / union                                               # (B,M,A)

    # ---- squared gt-center to anchor-center distances (sqrt dropped) --------
    gcx = (gx1 + gx2) * 0.5
    gcy = (gy1 + gy2) * 0.5
    dx = gcx - acx
    dy = gcy - acy
    dist_sq = dx * dx + dy * dy                                         # (B,M,A)

    # ---- packed sortable key: dist bits (non-negative f32) | lane index -----
    # (computed right after dist_sq so only key/work/iou stay live across the loop)
    lane = jax.lax.broadcasted_iota(jnp.int32, (1, 1, Apad), 2)         # (1,1,A) int32
    lane_bits = max(1, (Apad - 1).bit_length())
    keep_mask = jnp.int32(-(1 << lane_bits))      # == ~((1<<lane_bits)-1)
    INT_MAX = jnp.int32(2**31 - 1)

    key = (pltpu.bitcast(dist_sq, jnp.int32) & keep_mask) | lane        # (B,M,A)
    key = jnp.where(lane < n_anchors, key, INT_MAX)   # padded anchors never selected

    # ---- top-k smallest distances: 1 lane-reduction per iteration -----------
    work = key
    kth = None
    for _ in range(topk):
        kth = jnp.min(work, axis=2, keepdims=True)                      # (B,M,1)
        work = jnp.where(work == kth, INT_MAX, work)
    # keys are unique per valid lane -> exactly `topk` anchors satisfy key <= kth
    sel_topk = key <= kth                                               # (B,M,A)

    # ---- stats over topk IoUs > 0  (mean + unbiased std threshold) ----------
    # (single threshold per batch element, matching the torch module's flattened
    #  topk_iou[topk_iou > 0].mean()/.std())
    pos_sel = jnp.logical_and(sel_topk, iou > 0.0)
    v = jnp.where(pos_sel, iou, 0.0)
    S_m = jnp.sum(v, axis=2, keepdims=True)                             # (B,M,1)
    SQ_m = jnp.sum(v * v, axis=2, keepdims=True)
    C_m = jnp.sum(pos_sel.astype(jnp.float32), axis=2, keepdims=True)

    S = jnp.sum(S_m, axis=1, keepdims=True)                             # (B,1,1)
    SQ = jnp.sum(SQ_m, axis=1, keepdims=True)
    C = jnp.sum(C_m, axis=1, keepdims=True)

    mean = S / C                                      # C==0 -> NaN (matches torch)
    var = (SQ - S * S / C) / (C - 1.0)
    var = jnp.maximum(var, 0.0)                       # clamp FP cancellation
    var = jnp.where(C > 1.5, var, jnp.float32(jnp.nan))   # torch .std() of <2 elems -> NaN
    thr = mean + jnp.sqrt(var)                        # (B,1,1)

    # ---- masks written directly as bool at the unpadded (M_out, A_out) shape ----
    iou_o = iou[:, :M_out, :A_out]
    pos_ref[...] = (iou_o > thr).astype(pos_ref.dtype)
    neg_ref[...] = (iou_o < thr).astype(neg_ref.dtype)

    # ---- uniform IoU scores for the first gt box (pred_bboxes branch) -------
    row0 = iou[:, 0:1, :A_out]                        # (B,1,A_out)
    maxv = jnp.max(row0, axis=2, keepdims=True)
    scr_ref[...] = row0 / maxv                        # 0/0 -> NaN matches torch


# -----------------------------------------------------------------------------
# Wrapper
# -----------------------------------------------------------------------------
def assigner_pallas(gt_bboxes, anchors_np, topk=9, batch_block=8):
    gt_bboxes = jnp.asarray(gt_bboxes, jnp.float32)
    bs, M, _ = gt_bboxes.shape
    A = int(anchors_np.shape[0])
    Mpad = max(8, _round_up(M, 8))
    Apad = max(128, _round_up(A, 128))   # lane-dense internal compute

    # generation-aware sizing: v7x has 2 TCs and only 64 MiB VMEM per TC
    try:
        kind = jax.devices()[0].device_kind.lower()
    except Exception:
        kind = ""
    is_v7x = "v7" in kind
    vmem_limit = (48 << 20) if is_v7x else (64 << 20)

    # VMEM budget: ~10 live f32 (B,Mpad,Apad) temporaries + double-buffered outputs + gt in.
    per_b = (10 * Mpad * Apad * 4) + 2 * (2 * M * A + 4 * A) + 2 * Mpad * 4 * 4
    b_vmem = max(1, int((vmem_limit * 3 // 4) // per_b))
    # on v7x keep >= 2 grid steps so the "parallel" batch axis uses both TensorCores
    b_tc = max(1, (bs + 1) // 2) if is_v7x else bs
    B_BLK = max(1, min(batch_block, bs, b_vmem, b_tc))
    bs_pad = _round_up(bs, B_BLK)

    gt_p = jnp.zeros((bs_pad, Mpad, 4), jnp.float32).at[:bs, :M, :].set(gt_bboxes)

    # host-precomputed anchor table: x1,y1,x2,y2,cx,cy,area2,pad  -> (8, Apad)
    a = anchors_np.astype(np.float32)
    anc = np.zeros((8, Apad), np.float32)
    anc[0, :A] = a[:, 0]
    anc[1, :A] = a[:, 1]
    anc[2, :A] = a[:, 2]
    anc[3, :A] = a[:, 3]
    anc[4, :A] = (a[:, 0] + a[:, 2]) * 0.5
    anc[5, :A] = (a[:, 1] + a[:, 3]) * 0.5
    anc[6, :A] = (np.clip(a[:, 2] - a[:, 0], 0.0, None)
                  * np.clip(a[:, 3] - a[:, 1], 0.0, None))
    anc_t = jnp.asarray(anc)

    cost = pl.CostEstimate(
        flops=int(60 * bs_pad * Mpad * Apad),
        transcendentals=int(2 * bs_pad * Mpad * Apad),
        bytes_accessed=int(bs_pad * Mpad * 4 * 4 + 8 * Apad * 4
                           + 2 * bs_pad * M * A + bs_pad * A * 4),
    )

    def _call(mask_dtype):
        kernel = functools.partial(assigner_kernel, n_anchors=A, topk=topk)
        return pl.pallas_call(
            kernel,
            out_shape=(
                jax.ShapeDtypeStruct((bs_pad, M, A), mask_dtype),
                jax.ShapeDtypeStruct((bs_pad, M, A), mask_dtype),
                jax.ShapeDtypeStruct((bs_pad, 1, A), jnp.float32),
            ),
            grid_spec=pltpu.PrefetchScalarGridSpec(
                num_scalar_prefetch=0,
                grid=(bs_pad // B_BLK,),
                in_specs=[
                    pl.BlockSpec((B_BLK, Mpad, 4), lambda b: (b, 0, 0)),
                    pl.BlockSpec((8, Apad), lambda b: (0, 0)),
                ],
                out_specs=(
                    pl.BlockSpec((B_BLK, M, A), lambda b: (b, 0, 0)),
                    pl.BlockSpec((B_BLK, M, A), lambda b: (b, 0, 0)),
                    pl.BlockSpec((B_BLK, 1, A), lambda b: (b, 0, 0)),
                ),
            ),
            compiler_params=pltpu.CompilerParams(
                dimension_semantics=("parallel",),   # batch elements are independent
                vmem_limit_bytes=vmem_limit),
            cost_estimate=cost,
        )(gt_p, anc_t)

    try:
        pos_mask, neg_mask, scr = _call(jnp.bool_)
    except Exception:
        # Fallback: if this Mosaic build rejects bool outputs, emit int8 and cast once here
        # (still no slice pass — output is already at the exact (M, A) trailing shape).
        pos_i8, neg_i8, scr = _call(jnp.int8)
        pos_mask = pos_i8.astype(jnp.bool_)
        neg_mask = neg_i8.astype(jnp.bool_)

    if bs_pad != bs:
        pos_mask = pos_mask[:bs]
        neg_mask = neg_mask[:bs]
        scr = scr[:bs]
    uniform_scores = scr[:, 0, :]
    return pos_mask, neg_mask, uniform_scores


class AssignerPallas:
    def __init__(self, im_hw, anchor_num_per_level, topk=9):
        self.topk = topk
        self.anchors = build_anchors(im_hw, anchor_num_per_level)

    def __call__(self, gt_bboxes, images, pred_bboxes=None):
        # `images` is only used by the (cv2) debug branch of the torch module.
        pos_mask, neg_mask, uniform_scores = assigner_pallas(
            gt_bboxes, self.anchors, self.topk)
        bs = gt_bboxes.shape[0]
        A = self.anchors.shape[0]
        if pred_bboxes is not None:
            assigned_scores = uniform_scores          # ones * uniform_iou == uniform_iou
        else:
            assigned_scores = jnp.ones((bs, A), jnp.float32)
        return pos_mask, neg_mask, assigned_scores


# -----------------------------------------------------------------------------
if __name__ == "__main__":
    key = jax.random.PRNGKey(0)
    k1, k2, k3, k4 = jax.random.split(key, 4)

    bs, n_gt = 2, 3
    im_hw = (256, 256)
    anchor_num_per_level = [(8, 8), (4, 4), (2, 2)]   # A = 64 + 16 + 4 = 84

    xy = jax.random.uniform(k1, (bs, n_gt, 2), minval=10.0, maxval=150.0)
    wh = jax.random.uniform(k2, (bs, n_gt, 2), minval=30.0, maxval=100.0)
    gt_bboxes = jnp.concatenate([xy, xy + wh], axis=-1).astype(jnp.float32)

    images = jax.random.uniform(k3, (bs, 3, im_hw[0], im_hw[1]), dtype=jnp.float32)
    pred_bboxes = jax.random.uniform(k4, (bs, 10, 4), dtype=jnp.float32)  # only None-checked

    assigner = AssignerPallas(im_hw, anchor_num_per_level, topk=9)
    pos_mask, neg_mask, assigned_scores = assigner(gt_bboxes, images, pred_bboxes)

    jax.block_until_ready((pos_mask, neg_mask, assigned_scores))
    assert pos_mask.shape == (bs, n_gt, 84) and pos_mask.dtype == jnp.bool_
    assert neg_mask.shape == (bs, n_gt, 84) and neg_mask.dtype == jnp.bool_
    assert assigned_scores.shape == (bs, 84)
    print("KERNEL_OK")
</pallas_src>

<mosaic_0001>
module attributes {stable_mosaic.version = 11 : i64} {
  func.func @assigner_kernel(%arg0: i32, %arg1: memref<2x8x4xf32, #tpu.memory_space<vmem>>, %arg2: memref<8x128xf32, #tpu.memory_space<vmem>>, %arg3: memref<2x3x84xi32, #tpu.memory_space<vmem>>, %arg4: memref<2x3x84xi32, #tpu.memory_space<vmem>>, %arg5: memref<2x1x84xf32, #tpu.memory_space<vmem>>) attributes {dimension_semantics = [#tpu.dimension_semantics<parallel>], iteration_bounds = array<i64: 1>, scalar_prefetch = 0 : i64, scratch_operands = 0 : i64, tpu.core_type = #tpu.core_type<tc>, window_params = [{transform_indices = @transform_0, window_bounds = array<i64: 2, 8, 4>}, {pipeline_mode = #tpu.pipeline_mode<synchronous>, transform_indices = @transform_1, window_bounds = array<i64: 8, 128>}, {transform_indices = @transform_2, window_bounds = array<i64: 2, 3, 84>}, {transform_indices = @transform_3, window_bounds = array<i64: 2, 3, 84>}, {transform_indices = @transform_4, window_bounds = array<i64: 2, 1, 84>}]} {
    %c0 = arith.constant 0 : index
    %c0_0 = arith.constant 0 : index
    %c0_1 = arith.constant 0 : index
    %0 = vector.load %arg1[%c0, %c0_0, %c0_1] : memref<2x8x4xf32, #tpu.memory_space<vmem>>, vector<2x8x4xf32>
    %1 = vector.extract_strided_slice %0 {offsets = [0, 0, 0], sizes = [2, 8, 1], strides = [1, 1, 1]} : vector<2x8x4xf32> to vector<2x8x1xf32>
    %2 = vector.extract_strided_slice %0 {offsets = [0, 0, 1], sizes = [2, 8, 1], strides = [1, 1, 1]} : vector<2x8x4xf32> to vector<2x8x1xf32>
    %3 = vector.extract_strided_slice %0 {offsets = [0, 0, 2], sizes = [2, 8, 1], strides = [1, 1, 1]} : vector<2x8x4xf32> to vector<2x8x1xf32>
    %4 = vector.extract_strided_slice %0 {offsets = [0, 0, 3], sizes = [2, 8, 1], strides = [1, 1, 1]} : vector<2x8x4xf32> to vector<2x8x1xf32>
    %c0_2 = arith.constant 0 : index
    %c0_3 = arith.constant 0 : index
    %5 = vector.load %arg2[%c0_2, %c0_3] : memref<8x128xf32, #tpu.memory_space<vmem>>, vector<8x128xf32>
    %6 = vector.extract_strided_slice %5 {offsets = [0, 0], sizes = [1, 128], strides = [1, 1]} : vector<8x128xf32> to vector<1x128xf32>
    %7 = vector.shape_cast %6 : vector<1x128xf32> to vector<1x1x128xf32>
    %8 = vector.extract_strided_slice %5 {offsets = [1, 0], sizes = [1, 128], strides = [1, 1]} : vector<8x128xf32> to vector<1x128xf32>
    %9 = vector.shape_cast %8 : vector<1x128xf32> to vector<1x1x128xf32>
    %10 = vector.extract_strided_slice %5 {offsets = [2, 0], sizes = [1, 128], strides = [1, 1]} : vector<8x128xf32> to vector<1x128xf32>
    %11 = vector.shape_cast %10 : vector<1x128xf32> to vector<1x1x128xf32>
    %12 = vector.extract_strided_slice %5 {offsets = [3, 0], sizes = [1, 128], strides = [1, 1]} : vector<8x128xf32> to vector<1x128xf32>
    %13 = vector.shape_cast %12 : vector<1x128xf32> to vector<1x1x128xf32>
    %14 = vector.extract_strided_slice %5 {offsets = [4, 0], sizes = [1, 128], strides = [1, 1]} : vector<8x128xf32> to vector<1x128xf32>
    %15 = vector.shape_cast %14 : vector<1x128xf32> to vector<1x1x128xf32>
    %16 = vector.extract_strided_slice %5 {offsets = [5, 0], sizes = [1, 128], strides = [1, 1]} : vector<8x128xf32> to vector<1x128xf32>
    %17 = vector.shape_cast %16 : vector<1x128xf32> to vector<1x1x128xf32>
    %18 = vector.extract_strided_slice %5 {offsets = [6, 0], sizes = [1, 128], strides = [1, 1]} : vector<8x128xf32> to vector<1x128xf32>
    %19 = vector.shape_cast %18 : vector<1x128xf32> to vector<1x1x128xf32>
    %20 = vector.broadcast %1 : vector<2x8x1xf32> to vector<2x8x128xf32>
    %21 = vector.broadcast %7 : vector<1x1x128xf32> to vector<2x8x128xf32>
    %22 = arith.maximumf %20, %21 : vector<2x8x128xf32>
    %23 = vector.broadcast %2 : vector<2x8x1xf32> to vector<2x8x128xf32>
    %24 = vector.broadcast %9 : vector<1x1x128xf32> to vector<2x8x128xf32>
    %25 = arith.maximumf %23, %24 : vector<2x8x128xf32>
    %26 = vector.broadcast %3 : vector<2x8x1xf32> to vector<2x8x128xf32>
    %27 = vector.broadcast %11 : vector<1x1x128xf32> to vector<2x8x128xf32>
    %28 = arith.minimumf %26, %27 : vector<2x8x128xf32>
    %29 = vector.broadcast %4 : vector<2x8x1xf32> to vector<2x8x128xf32>
    %30 = vector.broadcast %13 : vector<1x1x128xf32> to vector<2x8x128xf32>
    %31 = arith.minimumf %29, %30 : vector<2x8x128xf32>
    %32 = arith.subf %28, %22 : vector<2x8x128xf32>
    %cst = arith.constant 0.000000e+00 : f32
    %33 = vector.broadcast %cst : f32 to vector<2x8x128xf32>
    %34 = arith.maximumf %32, %33 : vector<2x8x128xf32>
    %35 = arith.subf %31, %25 : vector<2x8x128xf32>
    %cst_4 = arith.constant 0.000000e+00 : f32
    %36 = vector.broadcast %cst_4 : f32 to vector<2x8x128xf32>
    %37 = arith.maximumf %35, %36 : vector<2x8x128xf32>
    %38 = arith.mulf %34, %37 : vector<2x8x128xf32>
    %39 = arith.subf %3, %1 : vector<2x8x1xf32>
    %cst_5 = arith.constant 0.000000e+00 : f32
    %40 = vector.broadcast %cst_5 : f32 to vector<2x8x1xf32>
    %41 = arith.maximumf %39, %40 : vector<2x8x1xf32>
    %42 = arith.subf %4, %2 : vector<2x8x1xf32>
    %cst_6 = arith.constant 0.000000e+00 : f32
    %43 = vector.broadcast %cst_6 : f32 to vector<2x8x1xf32>
    %44 = arith.maximumf %42, %43 : vector<2x8x1xf32>
    %45 = arith.mulf %41, %44 : vector<2x8x1xf32>
    %46 = vector.broadcast %45 : vector<2x8x1xf32> to vector<2x8x128xf32>
    %47 = vector.broadcast %19 : vector<1x1x128xf32> to vector<2x8x128xf32>
    %48 = arith.addf %46, %47 : vector<2x8x128xf32>
    %49 = arith.subf %48, %38 : vector<2x8x128xf32>
    %cst_7 = arith.constant 9.99999971E-10 : f32
    %50 = vector.broadcast %cst_7 : f32 to vector<2x8x128xf32>
    %51 = arith.addf %49, %50 : vector<2x8x128xf32>
    %52 = arith.divf %38, %51 : vector<2x8x128xf32>
    %53 = arith.addf %1, %3 : vector<2x8x1xf32>
    %cst_8 = arith.constant 5.000000e-01 : f32
    %54 = vector.broadcast %cst_8 : f32 to vector<2x8x1xf32>
    %55 = arith.mulf %53, %54 : vector<2x8x1xf32>
    %56 = arith.addf %2, %4 : vector<2x8x1xf32>
    %cst_9 = arith.constant 5.000000e-01 : f32
    %57 = vector.broadcast %cst_9 : f32 to vector<2x8x1xf32>
    %58 = arith.mulf %56, %57 : vector<2x8x1xf32>
    %59 = vector.broadcast %55 : vector<2x8x1xf32> to vector<2x8x128xf32>
    %60 = vector.broadcast %15 : vector<1x1x128xf32> to vector<2x8x128xf32>
    %61 = arith.subf %59, %60 : vector<2x8x128xf32>
    %62 = vector.broadcast %58 : vector<2x8x1xf32> to vector<2x8x128xf32>
    %63 = vector.broadcast %17 : vector<1x1x128xf32> to vector<2x8x128xf32>
    %64 = arith.subf %62, %63 : vector<2x8x128xf32>
    %65 = arith.mulf %61, %61 : vector<2x8x128xf32>
    %66 = arith.mulf %64, %64 : vector<2x8x128xf32>
    %67 = arith.addf %65, %66 : vector<2x8x128xf32>
    %68 = tpu.iota {dimensions = array<i32: 2>} : vector<1x1x128xi32>
    %69 = tpu.bitcast %67 : vector<2x8x128xf32> -> vector<2x8x128xi32>
    %c-128_i32 = arith.constant -128 : i32
    %70 = vector.broadcast %c-128_i32 : i32 to vector<2x8x128xi32>
    %71 = arith.andi %69, %70 : vector<2x8x128xi32>
    %72 = vector.broadcast %68 : vector<1x1x128xi32> to vector<2x8x128xi32>
    %73 = arith.ori %71, %72 : vector<2x8x128xi32>
    %c84_i32 = arith.constant 84 : i32
    %74 = vector.broadcast %c84_i32 : i32 to vector<1x1x128xi32>
    %75 = arith.cmpi slt, %68, %74 : vector<1x1x128xi32>
    %c2147483647_i32 = arith.constant 2147483647 : i32
    %76 = vector.shape_cast %75 : vector<1x1x128xi1> to vector<1x1x128xi1>
    %77 = vector.broadcast %76 : vector<1x1x128xi1> to vector<2x8x128xi1>
    %78 = vector.broadcast %c2147483647_i32 : i32 to vector<2x8x128xi32>
    %79 = arith.select %77, %73, %78 : vector<2x8x128xi1>, vector<2x8x128xi32>
    %cst_10 = arith.constant dense<2147483647> : vector<2x8xi32>
    %80 = vector.multi_reduction <minsi>, %79, %cst_10 [2] : vector<2x8x128xi32> to vector<2x8xi32>
    %81 = vector.shape_cast %80 : vector<2x8xi32> to vector<2x8x1xi32>
    %82 = vector.broadcast %81 : vector<2x8x1xi32> to vector<2x8x128xi32>
    %83 = arith.cmpi eq, %79, %82 : vector<2x8x128xi32>
    %c2147483647_i32_11 = arith.constant 2147483647 : i32
    %84 = vector.broadcast %c2147483647_i32_11 : i32 to vector<2x8x128xi32>
    %85 = arith.select %83, %84, %79 : vector<2x8x128xi1>, vector<2x8x128xi32>
    %cst_12 = arith.constant dense<2147483647> : vector<2x8xi32>
    %86 = vector.multi_reduction <minsi>, %85, %cst_12 [2] : vector<2x8x128xi32> to vector<2x8xi32>
    %87 = vector.shape_cast %86 : vector<2x8xi32> to vector<2x8x1xi32>
    %88 = vector.broadcast %87 : vector<2x8x1xi32> to vector<2x8x128xi32>
    %89 = arith.cmpi eq, %85, %88 : vector<2x8x128xi32>
    %c2147483647_i32_13 = arith.constant 2147483647 : i32
    %90 = vector.broadcast %c2147483647_i32_13 : i32 to vector<2x8x128xi32>
    %91 = arith.select %89, %90, %85 : vector<2x8x128xi1>, vector<2x8x128xi32>
    %cst_14 = arith.constant dense<2147483647> : vector<2x8xi32>
    %92 = vector.multi_reduction <minsi>, %91, %cst_14 [2] : vector<2x8x128xi32> to vector<2x8xi32>
    %93 = vector.shape_cast %92 : vector<2x8xi32> to vector<2x8x1xi32>
    %94 = vector.broadcast %93 : vector<2x8x1xi32> to vector<2x8x128xi32>
    %95 = arith.cmpi eq, %91, %94 : vector<2x8x128xi32>
    %c2147483647_i32_15 = arith.constant 2147483647 : i32
    %96 = vector.broadcast %c2147483647_i32_15 : i32 to vector<2x8x128xi32>
    %97 = arith.select %95, %96, %91 : vector<2x8x128xi1>, vector<2x8x128xi32>
    %cst_16 = arith.constant dense<2147483647> : vector<2x8xi32>
    %98 = vector.multi_reduction <minsi>, %97, %cst_16 [2] : vector<2x8x128xi32> to vector<2x8xi32>
    %99 = vector.shape_cast %98 : vector<2x8xi32> to vector<2x8x1xi32>
    %100 = vector.broadcast %99 : vector<2x8x1xi32> to vector<2x8x128xi32>
    %101 = arith.cmpi eq, %97, %100 : vector<2x8x128xi32>
    %c2147483647_i32_17 = arith.constant 2147483647 : i32
    %102 = vector.broadcast %c2147483647_i32_17 : i32 to vector<2x8x128xi32>
    %103 = arith.select %101, %102, %97 : vector<2x8x128xi1>, vector<2x8x128xi32>
    %cst_18 = arith.constant dense<2147483647> : vector<2x8xi32>
    %104 = vector.multi_reduction <minsi>, %103, %cst_18 [2] : vector<2x8x128xi32> to vector<2x8xi32>
    %105 = vector.shape_cast %104 : vector<2x8xi32> to vector<2x8x1xi32>
    %106 = vector.broadcast %105 : vector<2x8x1xi32> to vector<2x8x128xi32>
    %107 = arith.cmpi eq, %103, %106 : vector<2x8x128xi32>
    %c2147483647_i32_19 = arith.constant 2147483647 : i32
    %108 = vector.broadcast %c2147483647_i32_19 : i32 to vector<2x8x128xi32>
    %109 = arith.select %107, %108, %103 : vector<2x8x128xi1>, vector<2x8x128xi32>
    %cst_20 = arith.constant dense<2147483647> : vector<2x8xi32>
    %110 = vector.multi_reduction <minsi>, %109, %cst_20 [2] : vector<2x8x128xi32> to vector<2x8xi32>
    %111 = vector.shape_cast %110 : vector<2x8xi32> to vector<2x8x1xi32>
    %112 = vector.broadcast %111 : vector<2x8x1xi32> to vector<2x8x128xi32>
    %113 = arith.cmpi eq, %109, %112 : vector<2x8x128xi32>
    %c2147483647_i32_21 = arith.constant 2147483647 : i32
    %114 = vector.broadcast %c2147483647_i32_21 : i32 to vector<2x8x128xi32>
    %115 = arith.select %113, %114, %109 : vector<2x8x128xi1>, vector<2x8x128xi32>
    %cst_22 = arith.constant dense<2147483647> : vector<2x8xi32>
    %116 = vector.multi_reduction <minsi>, %115, %cst_22 [2] : vector<2x8x128xi32> to vector<2x8xi32>
    %117 = vector.shape_cast %116 : vector<2x8xi32> to vector<2x8x1xi32>
    %118 = vector.broadcast %117 : vector<2x8x1xi32> to vector<2x8x128xi32>
    %119 = arith.cmpi eq, %115, %118 : vector<2x8x128xi32>
    %c2147483647_i32_23 = arith.constant 2147483647 : i32
    %120 = vector.broadcast %c2147483647_i32_23 : i32 to vector<2x8x128xi32>
    %121 = arith.select %119, %120, %115 : vector<2x8x128xi1>, vector<2x8x128xi32>
    %cst_24 = arith.constant dense<2147483647> : vector<2x8xi32>
    %122 = vector.multi_reduction <minsi>, %121, %cst_24 [2] : vector<2x8x128xi32> to vector<2x8xi32>
    %123 = vector.shape_cast %122 : vector<2x8xi32> to vector<2x8x1xi32>
    %124 = vector.broadcast %123 : vector<2x8x1xi32> to vector<2x8x128xi32>
    %125 = arith.cmpi eq, %121, %124 : vector<2x8x128xi32>
    %c2147483647_i32_25 = arith.constant 2147483647 : i32
    %126 = vector.broadcast %c2147483647_i32_25 : i32 to vector<2x8x128xi32>
    %127 = arith.select %125, %126, %121 : vector<2x8x128xi1>, vector<2x8x128xi32>
    %cst_26 = arith.constant dense<2147483647> : vector<2x8xi32>
    %128 = vector.multi_reduction <minsi>, %127, %cst_26 [2] : vector<2x8x128xi32> to vector<2x8xi32>
    %129 = vector.shape_cast %128 : vector<2x8xi32> to vector<2x8x1xi32>
    %130 = vector.broadcast %129 : vector<2x8x1xi32> to vector<2x8x128xi32>
    %131 = arith.cmpi sle, %79, %130 : vector<2x8x128xi32>
    %cst_27 = arith.constant 0.000000e+00 : f32
    %132 = vector.broadcast %cst_27 : f32 to vector<2x8x128xf32>
    %133 = arith.cmpf ogt, %52, %132 : vector<2x8x128xf32>
    %134 = arith.andi %131, %133 : vector<2x8x128xi1>
    %cst_28 = arith.constant 0.000000e+00 : f32
    %135 = vector.broadcast %cst_28 : f32 to vector<2x8x128xf32>
    %136 = arith.select %134, %52, %135 : vector<2x8x128xi1>, vector<2x8x128xf32>
    %cst_29 = arith.constant dense<0.000000e+00> : vector<2x8xf32>
    %137 = vector.multi_reduction <add>, %136, %cst_29 [2] : vector<2x8x128xf32> to vector<2x8xf32>
    %138 = vector.shape_cast %137 : vector<2x8xf32> to vector<2x8x1xf32>
    %139 = arith.mulf %136, %136 : vector<2x8x128xf32>
    %cst_30 = arith.constant dense<0.000000e+00> : vector<2x8xf32>
    %140 = vector.multi_reduction <add>, %139, %cst_30 [2] : vector<2x8x128xf32> to vector<2x8xf32>
    %141 = vector.shape_cast %140 : vector<2x8xf32> to vector<2x8x1xf32>
    %142 = arith.extui %134 : vector<2x8x128xi1> to vector<2x8x128xi32>
    %143 = arith.sitofp %142 : vector<2x8x128xi32> to vector<2x8x128xf32>
    %cst_31 = arith.constant dense<0.000000e+00> : vector<2x8xf32>
    %144 = vector.multi_reduction <add>, %143, %cst_31 [2] : vector<2x8x128xf32> to vector<2x8xf32>
    %145 = vector.shape_cast %144 : vector<2x8xf32> to vector<2x8x1xf32>
    %cst_32 = arith.constant dense<0.000000e+00> : vector<2x1xf32>
    %146 = vector.multi_reduction <add>, %138, %cst_32 [1] : vector<2x8x1xf32> to vector<2x1xf32>
    %147 = vector.shape_cast %146 : vector<2x1xf32> to vector<2x1x1xf32>
    %cst_33 = arith.constant dense<0.000000e+00> : vector<2x1xf32>
    %148 = vector.multi_reduction <add>, %141, %cst_33 [1] : vector<2x8x1xf32> to vector<2x1xf32>
    %149 = vector.shape_cast %148 : vector<2x1xf32> to vector<2x1x1xf32>
    %cst_34 = arith.constant dense<0.000000e+00> : vector<2x1xf32>
    %150 = vector.multi_reduction <add>, %145, %cst_34 [1] : vector<2x8x1xf32> to vector<2x1xf32>
    %151 = vector.shape_cast %150 : vector<2x1xf32> to vector<2x1x1xf32>
    %152 = arith.divf %147, %151 : vector<2x1x1xf32>
    %153 = arith.mulf %147, %147 : vector<2x1x1xf32>
    %154 = arith.divf %153, %151 : vector<2x1x1xf32>
    %155 = arith.subf %149, %154 : vector<2x1x1xf32>
    %cst_35 = arith.constant 1.000000e+00 : f32
    %156 = vector.broadcast %cst_35 : f32 to vector<2x1x1xf32>
    %157 = arith.subf %151, %156 : vector<2x1x1xf32>
    %158 = arith.divf %155, %157 : vector<2x1x1xf32>
    %cst_36 = arith.constant 0.000000e+00 : f32
    %159 = vector.broadcast %cst_36 : f32 to vector<2x1x1xf32>
    %160 = arith.maximumf %158, %159 : vector<2x1x1xf32>
    %cst_37 = arith.constant 1.500000e+00 : f32
    %161 = vector.broadcast %cst_37 : f32 to vector<2x1x1xf32>
    %162 = arith.cmpf ogt, %151, %161 : vector<2x1x1xf32>
    %cst_38 = arith.constant 0x7FC00000 : f32
    %163 = vector.broadcast %cst_38 : f32 to vector<2x1x1xf32>
    %164 = arith.select %162, %160, %163 : vector<2x1x1xi1>, vector<2x1x1xf32>
    %165 = math.sqrt %164 : vector<2x1x1xf32>
    %166 = arith.addf %152, %165 : vector<2x1x1xf32>
    %167 = vector.extract_strided_slice %52 {offsets = [0, 0, 0], sizes = [2, 3, 84], strides = [1, 1, 1]} : vector<2x8x128xf32> to vector<2x3x84xf32>
    %168 = vector.broadcast %166 : vector<2x1x1xf32> to vector<2x3x84xf32>
    %169 = arith.cmpf ogt, %167, %168 : vector<2x3x84xf32>
    %c0_39 = arith.constant 0 : index
    %c0_40 = arith.constant 0 : index
    %c0_41 = arith.constant 0 : index
    %170 = vector.load %arg3[%c0_39, %c0_40, %c0_41] : memref<2x3x84xi32, #tpu.memory_space<vmem>>, vector<2x3x84xi32>
    %171 = arith.extui %169 : vector<2x3x84xi1> to vector<2x3x84xi32>
    %cst_42 = arith.constant dense<0> : vector<2x3x84xi32>
    %172 = arith.cmpi ne, %170, %cst_42 : vector<2x3x84xi32>
    tpu.vector_store %arg3[%c0_39, %c0_40, %c0_41], %171 {strides = array<i32>} : memref<2x3x84xi32, #tpu.memory_space<vmem>>, vector<2x3x84xi32>,
    %173 = vector.broadcast %166 : vector<2x1x1xf32> to vector<2x3x84xf32>
    %174 = arith.cmpf olt, %167, %173 : vector<2x3x84xf32>
    %c0_43 = arith.constant 0 : index
    %c0_44 = arith.constant 0 : index
    %c0_45 = arith.constant 0 : index
    %175 = vector.load %arg4[%c0_43, %c0_44, %c0_45] : memref<2x3x84xi32, #tpu.memory_space<vmem>>, vector<2x3x84xi32>
    %176 = arith.extui %174 : vector<2x3x84xi1> to vector<2x3x84xi32>
    %cst_46 = arith.constant dense<0> : vector<2x3x84xi32>
    %177 = arith.cmpi ne, %175, %cst_46 : vector<2x3x84xi32>
    tpu.vector_store %arg4[%c0_43, %c0_44, %c0_45], %176 {strides = array<i32>} : memref<2x3x84xi32, #tpu.memory_space<vmem>>, vector<2x3x84xi32>,
    %178 = vector.extract_strided_slice %52 {offsets = [0, 0, 0], sizes = [2, 1, 84], strides = [1, 1, 1]} : vector<2x8x128xf32> to vector<2x1x84xf32>
    %cst_47 = arith.constant dense<0xFF800000> : vector<2x1xf32>
    %179 = vector.multi_reduction <maximumf>, %178, %cst_47 [2] : vector<2x1x84xf32> to vector<2x1xf32>
    %180 = vector.shape_cast %179 : vector<2x1xf32> to vector<2x1x1xf32>
    %181 = vector.broadcast %180 : vector<2x1x1xf32> to vector<2x1x84xf32>
    %182 = arith.divf %178, %181 : vector<2x1x84xf32>
    %c0_48 = arith.constant 0 : index
    %c0_49 = arith.constant 0 : index
    %c0_50 = arith.constant 0 : index
    %183 = vector.load %arg5[%c0_48, %c0_49, %c0_50] : memref<2x1x84xf32, #tpu.memory_space<vmem>>, vector<2x1x84xf32>
    tpu.vector_store %arg5[%c0_48, %c0_49, %c0_50], %182 {strides = array<i32>} : memref<2x1x84xf32, #tpu.memory_space<vmem>>, vector<2x1x84xf32>,
    return
  }
  func.func @transform_0(%arg0: i32) -> (i32, i32, i32) {
    %c0_i32 = arith.constant 0 : i32
    %c0_i32_0 = arith.constant 0 : i32
    %c0_i32_1 = arith.constant 0 : i32
    return %arg0, %c0_i32, %c0_i32_0 : i32, i32, i32
  }
  func.func @transform_1(%arg0: i32) -> (i32, i32) {
    %c0_i32 = arith.constant 0 : i32
    %c0_i32_0 = arith.constant 0 : i32
    %c0_i32_1 = arith.constant 0 : i32
    return %c0_i32, %c0_i32_0 : i32, i32
  }
  func.func @transform_2(%arg0: i32) -> (i32, i32, i32) {
    %c0_i32 = arith.constant 0 : i32
    %c0_i32_0 = arith.constant 0 : i32
    %c0_i32_1 = arith.constant 0 : i32
    return %arg0, %c0_i32, %c0_i32_0 : i32, i32, i32
  }
  func.func @transform_3(%arg0: i32) -> (i32, i32, i32) {
    %c0_i32 = arith.constant 0 : i32
    %c0_i32_0 = arith.constant 0 : i32
    %c0_i32_1 = arith.constant 0 : i32
    return %arg0, %c0_i32, %c0_i32_0 : i32, i32, i32
  }
  func.func @transform_4(%arg0: i32) -> (i32, i32, i32) {
    %c0_i32 = arith.constant 0 : i32
    %c0_i32_0 = arith.constant 0 : i32
    %c0_i32_1 = arith.constant 0 : i32
    return %arg0, %c0_i32, %c0_i32_0 : i32, i32, i32
  }
}

module attributes {stable_mosaic.version = 11 : i64} {
  func.func @assigner_kernel(%arg0: i32, %arg1: memref<2x8x4xf32, #tpu.memory_space<vmem>>, %arg2: memref<8x128xf32, #tpu.memory_space<vmem>>, %arg3: memref<2x3x84xi8, #tpu.memory_space<vmem>>, %arg4: memref<2x3x84xi8, #tpu.memory_space<vmem>>, %arg5: memref<2x1x84xf32, #tpu.memory_space<vmem>>) attributes {dimension_semantics = [#tpu.dimension_semantics<parallel>], iteration_bounds = array<i64: 1>, scalar_prefetch = 0 : i64, scratch_operands = 0 : i64, tpu.core_type = #tpu.core_type<tc>, window_params = [{transform_indices = @transform_0, window_bounds = array<i64: 2, 8, 4>}, {pipeline_mode = #tpu.pipeline_mode<synchronous>, transform_indices = @transform_1, window_bounds = array<i64: 8, 128>}, {transform_indices = @transform_2, window_bounds = array<i64: 2, 3, 84>}, {transform_indices = @transform_3, window_bounds = array<i64: 2, 3, 84>}, {transform_indices = @transform_4, window_bounds = array<i64: 2, 1, 84>}]} {
    %c0 = arith.constant 0 : index
    %c0_0 = arith.constant 0 : index
    %c0_1 = arith.constant 0 : index
    %0 = vector.load %arg1[%c0, %c0_0, %c0_1] : memref<2x8x4xf32, #tpu.memory_space<vmem>>, vector<2x8x4xf32>
    %1 = vector.extract_strided_slice %0 {offsets = [0, 0, 0], sizes = [2, 8, 1], strides = [1, 1, 1]} : vector<2x8x4xf32> to vector<2x8x1xf32>
    %2 = vector.extract_strided_slice %0 {offsets = [0, 0, 1], sizes = [2, 8, 1], strides = [1, 1, 1]} : vector<2x8x4xf32> to vector<2x8x1xf32>
    %3 = vector.extract_strided_slice %0 {offsets = [0, 0, 2], sizes = [2, 8, 1], strides = [1, 1, 1]} : vector<2x8x4xf32> to vector<2x8x1xf32>
    %4 = vector.extract_strided_slice %0 {offsets = [0, 0, 3], sizes = [2, 8, 1], strides = [1, 1, 1]} : vector<2x8x4xf32> to vector<2x8x1xf32>
    %c0_2 = arith.constant 0 : index
    %c0_3 = arith.constant 0 : index
    %5 = vector.load %arg2[%c0_2, %c0_3] : memref<8x128xf32, #tpu.memory_space<vmem>>, vector<8x128xf32>
    %6 = vector.extract_strided_slice %5 {offsets = [0, 0], sizes = [1, 128], strides = [1, 1]} : vector<8x128xf32> to vector<1x128xf32>
    %7 = vector.shape_cast %6 : vector<1x128xf32> to vector<1x1x128xf32>
    %8 = vector.extract_strided_slice %5 {offsets = [1, 0], sizes = [1, 128], strides = [1, 1]} : vector<8x128xf32> to vector<1x128xf32>
    %9 = vector.shape_cast %8 : vector<1x128xf32> to vector<1x1x128xf32>
    %10 = vector.extract_strided_slice %5 {offsets = [2, 0], sizes = [1, 128], strides = [1, 1]} : vector<8x128xf32> to vector<1x128xf32>
    %11 = vector.shape_cast %10 : vector<1x128xf32> to vector<1x1x128xf32>
    %12 = vector.extract_strided_slice %5 {offsets = [3, 0], sizes = [1, 128], strides = [1, 1]} : vector<8x128xf32> to vector<1x128xf32>
    %13 = vector.shape_cast %12 : vector<1x128xf32> to vector<1x1x128xf32>
    %14 = vector.extract_strided_slice %5 {offsets = [4, 0], sizes = [1, 128], strides = [1, 1]} : vector<8x128xf32> to vector<1x128xf32>
    %15 = vector.shape_cast %14 : vector<1x128xf32> to vector<1x1x128xf32>
    %16 = vector.extract_strided_slice %5 {offsets = [5, 0], sizes = [1, 128], strides = [1, 1]} : vector<8x128xf32> to vector<1x128xf32>
    %17 = vector.shape_cast %16 : vector<1x128xf32> to vector<1x1x128xf32>
    %18 = vector.extract_strided_slice %5 {offsets = [6, 0], sizes = [1, 128], strides = [1, 1]} : vector<8x128xf32> to vector<1x128xf32>
    %19 = vector.shape_cast %18 : vector<1x128xf32> to vector<1x1x128xf32>
    %20 = vector.broadcast %1 : vector<2x8x1xf32> to vector<2x8x128xf32>
    %21 = vector.broadcast %7 : vector<1x1x128xf32> to vector<2x8x128xf32>
    %22 = arith.maximumf %20, %21 : vector<2x8x128xf32>
    %23 = vector.broadcast %2 : vector<2x8x1xf32> to vector<2x8x128xf32>
    %24 = vector.broadcast %9 : vector<1x1x128xf32> to vector<2x8x128xf32>
    %25 = arith.maximumf %23, %24 : vector<2x8x128xf32>
    %26 = vector.broadcast %3 : vector<2x8x1xf32> to vector<2x8x128xf32>
    %27 = vector.broadcast %11 : vector<1x1x128xf32> to vector<2x8x128xf32>
    %28 = arith.minimumf %26, %27 : vector<2x8x128xf32>
    %29 = vector.broadcast %4 : vector<2x8x1xf32> to vector<2x8x128xf32>
    %30 = vector.broadcast %13 : vector<1x1x128xf32> to vector<2x8x128xf32>
    %31 = arith.minimumf %29, %30 : vector<2x8x128xf32>
    %32 = arith.subf %28, %22 : vector<2x8x128xf32>
    %cst = arith.constant 0.000000e+00 : f32
    %33 = vector.broadcast %cst : f32 to vector<2x8x128xf32>
    %34 = arith.maximumf %32, %33 : vector<2x8x128xf32>
    %35 = arith.subf %31, %25 : vector<2x8x128xf32>
    %cst_4 = arith.constant 0.000000e+00 : f32
    %36 = vector.broadcast %cst_4 : f32 to vector<2x8x128xf32>
    %37 = arith.maximumf %35, %36 : vector<2x8x128xf32>
    %38 = arith.mulf %34, %37 : vector<2x8x128xf32>
    %39 = arith.subf %3, %1 : vector<2x8x1xf32>
    %cst_5 = arith.constant 0.000000e+00 : f32
    %40 = vector.broadcast %cst_5 : f32 to vector<2x8x1xf32>
    %41 = arith.maximumf %39, %40 : vector<2x8x1xf32>
    %42 = arith.subf %4, %2 : vector<2x8x1xf32>
    %cst_6 = arith.constant 0.000000e+00 : f32
    %43 = vector.broadcast %cst_6 : f32 to vector<2x8x1xf32>
    %44 = arith.maximumf %42, %43 : vector<2x8x1xf32>
    %45 = arith.mulf %41, %44 : vector<2x8x1xf32>
    %46 = vector.broadcast %45 : vector<2x8x1xf32> to vector<2x8x128xf32>
    %47 = vector.broadcast %19 : vector<1x1x128xf32> to vector<2x8x128xf32>
    %48 = arith.addf %46, %47 : vector<2x8x128xf32>
    %49 = arith.subf %48, %38 : vector<2x8x128xf32>
    %cst_7 = arith.constant 9.99999971E-10 : f32
    %50 = vector.broadcast %cst_7 : f32 to vector<2x8x128xf32>
    %51 = arith.addf %49, %50 : vector<2x8x128xf32>
    %52 = arith.divf %38, %51 : vector<2x8x128xf32>
    %53 = arith.addf %1, %3 : vector<2x8x1xf32>
    %cst_8 = arith.constant 5.000000e-01 : f32
    %54 = vector.broadcast %cst_8 : f32 to vector<2x8x1xf32>
    %55 = arith.mulf %53, %54 : vector<2x8x1xf32>
    %56 = arith.addf %2, %4 : vector<2x8x1xf32>
    %cst_9 = arith.constant 5.000000e-01 : f32
    %57 = vector.broadcast %cst_9 : f32 to vector<2x8x1xf32>
    %58 = arith.mulf %56, %57 : vector<2x8x1xf32>
    %59 = vector.broadcast %55 : vector<2x8x1xf32> to vector<2x8x128xf32>
    %60 = vector.broadcast %15 : vector<1x1x128xf32> to vector<2x8x128xf32>
    %61 = arith.subf %59, %60 : vector<2x8x128xf32>
    %62 = vector.broadcast %58 : vector<2x8x1xf32> to vector<2x8x128xf32>
    %63 = vector.broadcast %17 : vector<1x1x128xf32> to vector<2x8x128xf32>
    %64 = arith.subf %62, %63 : vector<2x8x128xf32>
    %65 = arith.mulf %61, %61 : vector<2x8x128xf32>
    %66 = arith.mulf %64, %64 : vector<2x8x128xf32>
    %67 = arith.addf %65, %66 : vector<2x8x128xf32>
    %68 = tpu.iota {dimensions = array<i32: 2>} : vector<1x1x128xi32>
    %69 = tpu.bitcast %67 : vector<2x8x128xf32> -> vector<2x8x128xi32>
    %c-128_i32 = arith.constant -128 : i32
    %70 = vector.broadcast %c-128_i32 : i32 to vector<2x8x128xi32>
    %71 = arith.andi %69, %70 : vector<2x8x128xi32>
    %72 = vector.broadcast %68 : vector<1x1x128xi32> to vector<2x8x128xi32>
    %73 = arith.ori %71, %72 : vector<2x8x128xi32>
    %c84_i32 = arith.constant 84 : i32
    %74 = vector.broadcast %c84_i32 : i32 to vector<1x1x128xi32>
    %75 = arith.cmpi slt, %68, %74 : vector<1x1x128xi32>
    %c2147483647_i32 = arith.constant 2147483647 : i32
    %76 = vector.shape_cast %75 : vector<1x1x128xi1> to vector<1x1x128xi1>
    %77 = vector.broadcast %76 : vector<1x1x128xi1> to vector<2x8x128xi1>
    %78 = vector.broadcast %c2147483647_i32 : i32 to vector<2x8x128xi32>
    %79 = arith.select %77, %73, %78 : vector<2x8x128xi1>, vector<2x8x128xi32>
    %cst_10 = arith.constant dense<2147483647> : vector<2x8xi32>
    %80 = vector.multi_reduction <minsi>, %79, %cst_10 [2] : vector<2x8x128xi32> to vector<2x8xi32>
    %81 = vector.shape_cast %80 : vector<2x8xi32> to vector<2x8x1xi32>
    %82 = vector.broadcast %81 : vector<2x8x1xi32> to vector<2x8x128xi32>
    %83 = arith.cmpi eq, %79, %82 : vector<2x8x128xi32>
    %c2147483647_i32_11 = arith.constant 2147483647 : i32
    %84 = vector.broadcast %c2147483647_i32_11 : i32 to vector<2x8x128xi32>
    %85 = arith.select %83, %84, %79 : vector<2x8x128xi1>, vector<2x8x128xi32>
    %cst_12 = arith.constant dense<2147483647> : vector<2x8xi32>
    %86 = vector.multi_reduction <minsi>, %85, %cst_12 [2] : vector<2x8x128xi32> to vector<2x8xi32>
    %87 = vector.shape_cast %86 : vector<2x8xi32> to vector<2x8x1xi32>
    %88 = vector.broadcast %87 : vector<2x8x1xi32> to vector<2x8x128xi32>
    %89 = arith.cmpi eq, %85, %88 : vector<2x8x128xi32>
    %c2147483647_i32_13 = arith.constant 2147483647 : i32
    %90 = vector.broadcast %c2147483647_i32_13 : i32 to vector<2x8x128xi32>
    %91 = arith.select %89, %90, %85 : vector<2x8x128xi1>, vector<2x8x128xi32>
    %cst_14 = arith.constant dense<2147483647> : vector<2x8xi32>
    %92 = vector.multi_reduction <minsi>, %91, %cst_14 [2] : vector<2x8x128xi32> to vector<2x8xi32>
    %93 = vector.shape_cast %92 : vector<2x8xi32> to vector<2x8x1xi32>
    %94 = vector.broadcast %93 : vector<2x8x1xi32> to vector<2x8x128xi32>
    %95 = arith.cmpi eq, %91, %94 : vector<2x8x128xi32>
    %c2147483647_i32_15 = arith.constant 2147483647 : i32
    %96 = vector.broadcast %c2147483647_i32_15 : i32 to vector<2x8x128xi32>
    %97 = arith.select %95, %96, %91 : vector<2x8x128xi1>, vector<2x8x128xi32>
    %cst_16 = arith.constant dense<2147483647> : vector<2x8xi32>
    %98 = vector.multi_reduction <minsi>, %97, %cst_16 [2] : vector<2x8x128xi32> to vector<2x8xi32>
    %99 = vector.shape_cast %98 : vector<2x8xi32> to vector<2x8x1xi32>
    %100 = vector.broadcast %99 : vector<2x8x1xi32> to vector<2x8x128xi32>
    %101 = arith.cmpi eq, %97, %100 : vector<2x8x128xi32>
    %c2147483647_i32_17 = arith.constant 2147483647 : i32
    %102 = vector.broadcast %c2147483647_i32_17 : i32 to vector<2x8x128xi32>
    %103 = arith.select %101, %102, %97 : vector<2x8x128xi1>, vector<2x8x128xi32>
    %cst_18 = arith.constant dense<2147483647> : vector<2x8xi32>
    %104 = vector.multi_reduction <minsi>, %103, %cst_18 [2] : vector<2x8x128xi32> to vector<2x8xi32>
    %105 = vector.shape_cast %104 : vector<2x8xi32> to vector<2x8x1xi32>
    %106 = vector.broadcast %105 : vector<2x8x1xi32> to vector<2x8x128xi32>
    %107 = arith.cmpi eq, %103, %106 : vector<2x8x128xi32>
    %c2147483647_i32_19 = arith.constant 2147483647 : i32
    %108 = vector.broadcast %c2147483647_i32_19 : i32 to vector<2x8x128xi32>
    %109 = arith.select %107, %108, %103 : vector<2x8x128xi1>, vector<2x8x128xi32>
    %cst_20 = arith.constant dense<2147483647> : vector<2x8xi32>
    %110 = vector.multi_reduction <minsi>, %109, %cst_20 [2] : vector<2x8x128xi32> to vector<2x8xi32>
    %111 = vector.shape_cast %110 : vector<2x8xi32> to vector<2x8x1xi32>
    %112 = vector.broadcast %111 : vector<2x8x1xi32> to vector<2x8x128xi32>
    %113 = arith.cmpi eq, %109, %112 : vector<2x8x128xi32>
    %c2147483647_i32_21 = arith.constant 2147483647 : i32
    %114 = vector.broadcast %c2147483647_i32_21 : i32 to vector<2x8x128xi32>
    %115 = arith.select %113, %114, %109 : vector<2x8x128xi1>, vector<2x8x128xi32>
    %cst_22 = arith.constant dense<2147483647> : vector<2x8xi32>
    %116 = vector.multi_reduction <minsi>, %115, %cst_22 [2] : vector<2x8x128xi32> to vector<2x8xi32>
    %117 = vector.shape_cast %116 : vector<2x8xi32> to vector<2x8x1xi32>
    %118 = vector.broadcast %117 : vector<2x8x1xi32> to vector<2x8x128xi32>
    %119 = arith.cmpi eq, %115, %118 : vector<2x8x128xi32>
    %c2147483647_i32_23 = arith.constant 2147483647 : i32
    %120 = vector.broadcast %c2147483647_i32_23 : i32 to vector<2x8x128xi32>
    %121 = arith.select %119, %120, %115 : vector<2x8x128xi1>, vector<2x8x128xi32>
    %cst_24 = arith.constant dense<2147483647> : vector<2x8xi32>
    %122 = vector.multi_reduction <minsi>, %121, %cst_24 [2] : vector<2x8x128xi32> to vector<2x8xi32>
    %123 = vector.shape_cast %122 : vector<2x8xi32> to vector<2x8x1xi32>
    %124 = vector.broadcast %123 : vector<2x8x1xi32> to vector<2x8x128xi32>
    %125 = arith.cmpi eq, %121, %124 : vector<2x8x128xi32>
    %c2147483647_i32_25 = arith.constant 2147483647 : i32
    %126 = vector.broadcast %c2147483647_i32_25 : i32 to vector<2x8x128xi32>
    %127 = arith.select %125, %126, %121 : vector<2x8x128xi1>, vector<2x8x128xi32>
    %cst_26 = arith.constant dense<2147483647> : vector<2x8xi32>
    %128 = vector.multi_reduction <minsi>, %127, %cst_26 [2] : vector<2x8x128xi32> to vector<2x8xi32>
    %129 = vector.shape_cast %128 : vector<2x8xi32> to vector<2x8x1xi32>
    %130 = vector.broadcast %129 : vector<2x8x1xi32> to vector<2x8x128xi32>
    %131 = arith.cmpi sle, %79, %130 : vector<2x8x128xi32>
    %cst_27 = arith.constant 0.000000e+00 : f32
    %132 = vector.broadcast %cst_27 : f32 to vector<2x8x128xf32>
    %133 = arith.cmpf ogt, %52, %132 : vector<2x8x128xf32>
    %134 = arith.andi %131, %133 : vector<2x8x128xi1>
    %cst_28 = arith.constant 0.000000e+00 : f32
    %135 = vector.broadcast %cst_28 : f32 to vector<2x8x128xf32>
    %136 = arith.select %134, %52, %135 : vector<2x8x128xi1>, vector<2x8x128xf32>
    %cst_29 = arith.constant dense<0.000000e+00> : vector<2x8xf32>
    %137 = vector.multi_reduction <add>, %136, %cst_29 [2] : vector<2x8x128xf32> to vector<2x8xf32>
    %138 = vector.shape_cast %137 : vector<2x8xf32> to vector<2x8x1xf32>
    %139 = arith.mulf %136, %136 : vector<2x8x128xf32>
    %cst_30 = arith.constant dense<0.000000e+00> : vector<2x8xf32>
    %140 = vector.multi_reduction <add>, %139, %cst_30 [2] : vector<2x8x128xf32> to vector<2x8xf32>
    %141 = vector.shape_cast %140 : vector<2x8xf32> to vector<2x8x1xf32>
    %142 = arith.extui %134 : vector<2x8x128xi1> to vector<2x8x128xi32>
    %143 = arith.sitofp %142 : vector<2x8x128xi32> to vector<2x8x128xf32>
    %cst_31 = arith.constant dense<0.000000e+00> : vector<2x8xf32>
    %144 = vector.multi_reduction <add>, %143, %cst_31 [2] : vector<2x8x128xf32> to vector<2x8xf32>
    %145 = vector.shape_cast %144 : vector<2x8xf32> to vector<2x8x1xf32>
    %cst_32 = arith.constant dense<0.000000e+00> : vector<2x1xf32>
    %146 = vector.multi_reduction <add>, %138, %cst_32 [1] : vector<2x8x1xf32> to vector<2x1xf32>
    %147 = vector.shape_cast %146 : vector<2x1xf32> to vector<2x1x1xf32>
    %cst_33 = arith.constant dense<0.000000e+00> : vector<2x1xf32>
    %148 = vector.multi_reduction <add>, %141, %cst_33 [1] : vector<2x8x1xf32> to vector<2x1xf32>
    %149 = vector.shape_cast %148 : vector<2x1xf32> to vector<2x1x1xf32>
    %cst_34 = arith.constant dense<0.000000e+00> : vector<2x1xf32>
    %150 = vector.multi_reduction <add>, %145, %cst_34 [1] : vector<2x8x1xf32> to vector<2x1xf32>
    %151 = vector.shape_cast %150 : vector<2x1xf32> to vector<2x1x1xf32>
    %152 = arith.divf %147, %151 : vector<2x1x1xf32>
    %153 = arith.mulf %147, %147 : vector<2x1x1xf32>
    %154 = arith.divf %153, %151 : vector<2x1x1xf32>
    %155 = arith.subf %149, %154 : vector<2x1x1xf32>
    %cst_35 = arith.constant 1.000000e+00 : f32
    %156 = vector.broadcast %cst_35 : f32 to vector<2x1x1xf32>
    %157 = arith.subf %151, %156 : vector<2x1x1xf32>
    %158 = arith.divf %155, %157 : vector<2x1x1xf32>
    %cst_36 = arith.constant 0.000000e+00 : f32
    %159 = vector.broadcast %cst_36 : f32 to vector<2x1x1xf32>
    %160 = arith.maximumf %158, %159 : vector<2x1x1xf32>
    %cst_37 = arith.constant 1.500000e+00 : f32
    %161 = vector.broadcast %cst_37 : f32 to vector<2x1x1xf32>
    %162 = arith.cmpf ogt, %151, %161 : vector<2x1x1xf32>
    %cst_38 = arith.constant 0x7FC00000 : f32
    %163 = vector.broadcast %cst_38 : f32 to vector<2x1x1xf32>
    %164 = arith.select %162, %160, %163 : vector<2x1x1xi1>, vector<2x1x1xf32>
    %165 = math.sqrt %164 : vector<2x1x1xf32>
    %166 = arith.addf %152, %165 : vector<2x1x1xf32>
    %167 = vector.extract_strided_slice %52 {offsets = [0, 0, 0], sizes = [2, 3, 84], strides = [1, 1, 1]} : vector<2x8x128xf32> to vector<2x3x84xf32>
    %168 = vector.broadcast %166 : vector<2x1x1xf32> to vector<2x3x84xf32>
    %169 = arith.cmpf ogt, %167, %168 : vector<2x3x84xf32>
    %170 = arith.extui %169 : vector<2x3x84xi1> to vector<2x3x84xi8>
    %c0_39 = arith.constant 0 : index
    %c0_40 = arith.constant 0 : index
    %c0_41 = arith.constant 0 : index
    %171 = vector.load %arg3[%c0_39, %c0_40, %c0_41] : memref<2x3x84xi8, #tpu.memory_space<vmem>>, vector<2x3x84xi8>
    tpu.vector_store %arg3[%c0_39, %c0_40, %c0_41], %170 {strides = array<i32>} : memref<2x3x84xi8, #tpu.memory_space<vmem>>, vector<2x3x84xi8>,
    %172 = vector.broadcast %166 : vector<2x1x1xf32> to vector<2x3x84xf32>
    %173 = arith.cmpf olt, %167, %172 : vector<2x3x84xf32>
    %174 = arith.extui %173 : vector<2x3x84xi1> to vector<2x3x84xi8>
    %c0_42 = arith.constant 0 : index
    %c0_43 = arith.constant 0 : index
    %c0_44 = arith.constant 0 : index
    %175 = vector.load %arg4[%c0_42, %c0_43, %c0_44] : memref<2x3x84xi8, #tpu.memory_space<vmem>>, vector<2x3x84xi8>
    tpu.vector_store %arg4[%c0_42, %c0_43, %c0_44], %174 {strides = array<i32>} : memref<2x3x84xi8, #tpu.memory_space<vmem>>, vector<2x3x84xi8>,
    %176 = vector.extract_strided_slice %52 {offsets = [0, 0, 0], sizes = [2, 1, 84], strides = [1, 1, 1]} : vector<2x8x128xf32> to vector<2x1x84xf32>
    %cst_45 = arith.constant dense<0xFF800000> : vector<2x1xf32>
    %177 = vector.multi_reduction <maximumf>, %176, %cst_45 [2] : vector<2x1x84xf32> to vector<2x1xf32>
    %178 = vector.shape_cast %177 : vector<2x1xf32> to vector<2x1x1xf32>
    %179 = vector.broadcast %178 : vector<2x1x1xf32> to vector<2x1x84xf32>
    %180 = arith.divf %176, %179 : vector<2x1x84xf32>
    %c0_46 = arith.constant 0 : index
    %c0_47 = arith.constant 0 : index
    %c0_48 = arith.constant 0 : index
    %181 = vector.load %arg5[%c0_46, %c0_47, %c0_48] : memref<2x1x84xf32, #tpu.memory_space<vmem>>, vector<2x1x84xf32>
    tpu.vector_store %arg5[%c0_46, %c0_47, %c0_48], %180 {strides = array<i32>} : memref<2x1x84xf32, #tpu.memory_space<vmem>>, vector<2x1x84xf32>,
    return
  }
  func.func @transform_0(%arg0: i32) -> (i32, i32, i32) {
    %c0_i32 = arith.constant 0 : i32
    %c0_i32_0 = arith.constant 0 : i32
    %c0_i32_1 = arith.constant 0 : i32
    return %arg0, %c0_i32, %c0_i32_0 : i32, i32, i32
  }
  func.func @transform_1(%arg0: i32) -> (i32, i32) {
    %c0_i32 = arith.constant 0 : i32
    %c0_i32_0 = arith.constant 0 : i32
    %c0_i32_1 = arith.constant 0 : i32
    return %c0_i32, %c0_i32_0 : i32, i32
  }
  func.func @transform_2(%arg0: i32) -> (i32, i32, i32) {
    %c0_i32 = arith.constant 0 : i32
    %c0_i32_0 = arith.constant 0 : i32
    %c0_i32_1 = arith.constant 0 : i32
    return %arg0, %c0_i32, %c0_i32_0 : i32, i32, i32
  }
  func.func @transform_3(%arg0: i32) -> (i32, i32, i32) {
    %c0_i32 = arith.constant 0 : i32
    %c0_i32_0 = arith.constant 0 : i32
    %c0_i32_1 = arith.constant 0 : i32
    return %arg0, %c0_i32, %c0_i32_0 : i32, i32, i32
  }
  func.func @transform_4(%arg0: i32) -> (i32, i32, i32) {
    %c0_i32 = arith.constant 0 : i32
    %c0_i32_0 = arith.constant 0 : i32
    %c0_i32_1 = arith.constant 0 : i32
    return %arg0, %c0_i32, %c0_i32_0 : i32, i32, i32
  }
}

</mosaic_0001>

<bundles_post_ra>
// kernel: tpu_custom_call.1
= control target key start
LH: loop header
LB: loop body
LE: loop exit
PB: predicated region body
PF: predicated region fallthrough
CT: control target
= control target key end

     0   :  { %10 = vsyncpa [#allocation3], 0  ;;  %s1053_s0 = inlined_call_operand.hbm [shape: f32[2,8,4], index: 0, kind: input, shape index: {}]   ;;  %s1054_s1 = inlined_call_operand.hbm [shape: f32[8,128], index: 1, kind: input, shape index: {}]   ;;  %s1055_s2 = inlined_call_operand.hbm [shape: s32[2,3,84], index: 2, kind: output, shape index: {0}]   ;;  %s1056_s3 = inlined_call_operand.hbm [shape: s32[2,3,84], index: 3, kind: output, shape index: {1}]   ;;  %s1057_s4 = inlined_call_operand.hbm [shape: f32[2,1,84], index: 4, kind: output, shape index: {2}]  }
   0x1   :  { %11 = vsyncpa [#allocation6], 0 }
   0x2   :  { %12 = vsyncpa [#allocation4], 0 }
   0x3   :  { %13 = vsyncpa [#allocation9], 0  ;;  %s848_s15 = smov [#allocation2]   ;;  %s730_s19 = scalar_lea.hbm %s1053_s0, 256 }
   0x4   :  { %s19_s16 = sshll.u32 %s848_s15, 4  ;;  %p731_p0 = scmp.ne.s32.totalorder %s1053_s0, %s730_s19  ;;  %s20_s16 = int_to_ptr.vmem [resolvable:$true] %s19_s16 }
   0x5   :  { %p734_p1 = scmp.lt.u32.totalorder %s730_s19, %s1053_s0 }
   0x7   :  { %p736_p2 = pnand %p734_p1, %p731_p0 }
   0x9   :  { %739 = shalt.err (!%p736_p2)
}
   0xa   :  { %s740_s24 = scalar_lea.vmem %s20_s16, 256  ;;  %p745_p4 = scmp.lt.s32.totalorder %s20_s16, %s20_s16 }
   0xb   :  { %p741_p3 = scmp.ne.s32.totalorder %s20_s16, %s740_s24  ;;  %p746_p5 = scmp.lt.s32.totalorder %s740_s24, %s740_s24 }
   0xd   :  { %p747_p6 = por %p746_p5, %p745_p4 }
   0xf   :  { %p748_p7 = pnand %p747_p6, %p741_p3 }
  0x11   :  { %751 = shalt.err (!%p748_p7)
}
  0x12   :  { %s849_s25 = smov 128   ;;  %s850_s26 = smov 8  }
  0x13   :  { %25 = dma.hbm_to_vmem [thread:$0]  %s1053_s0, 256, %s20_s16, [#allocation3], %s849_s25, %s849_s25, %s850_s26  }
  0x14   :  { %s851_s29 = smov [#allocation5]   ;;  %s752_s7 = scalar_lea.hbm %s1054_s1, 128 }
  0x15   :  { %s32_s30 = sshll.u32 %s851_s29, 4  ;;  %p753_p8 = scmp.ne.s32.totalorder %s1054_s1, %s752_s7  ;;  %s33_s30 = int_to_ptr.vmem [resolvable:$true] %s32_s30 }
  0x16   :  { %p756_p9 = scmp.lt.u32.totalorder %s752_s7, %s1054_s1 }
  0x18   :  { %p758_p10 = pnand %p756_p9, %p753_p8 }
  0x1a   :  { %761 = shalt.err (!%p758_p10)
}
  0x1b   :  { %s762_s12 = scalar_lea.vmem %s33_s30, 128  ;;  %p767_p12 = scmp.lt.s32.totalorder %s33_s30, %s33_s30 }
  0x1c   :  { %p763_p11 = scmp.ne.s32.totalorder %s33_s30, %s762_s12  ;;  %p768_p13 = scmp.lt.s32.totalorder %s762_s12, %s762_s12 }
  0x1e   :  { %p769_p0 = por %p768_p13, %p767_p12 }
  0x20   :  { %p770_p1 = pnand %p769_p0, %p763_p11 }
  0x22   :  { %773 = shalt.err (!%p770_p1)
}
  0x23   :  { %35 = dma.hbm_to_vmem [thread:$0]  %s1054_s1, 128, %s33_s30, [#allocation6]  }
  0x24   :  { %840 = dma.done.wait [#allocation3], 256  }
  0x25   :  { %841 = vsyncadd [#allocation3], 4294967040 }
  0x26   :  { %842 = dma.done.wait [#allocation6], 128  }
  0x27   :  { %843 = vsyncadd [#allocation6], 4294967168  ;;  %v852_v0 = vmov 1   ;;  %v853_v1 = vmov 0   ;;  %v918_v2 = vld [vmem:[#allocation2] sm:$0xff]  ;;  %s854_s14 = smov 126   ;;  %v55_v10 = vlaneseq }
  0x28   :  { %699 = vset.pattern.permute.xlu0 %v852_v0  ;;  %698 = vset.pattern.permute.xlu1 %v853_v1  ;;  %v921_v3 = vld [vmem:[#allocation2 + $0x8] sm:$0xff]  ;;  %v933_v14 = vld [vmem:[#allocation5] sm:$0xff]  ;;  %s855_s1 = smov 2   ;;  %s856_s15 = smov 127  }
  0x29   :  { %157 = vrot.lane.b32.xlu0 %v918_v2, %s854_s14  ;;  %v929_v11 = vshrl.u32 %v55_v10, 7  ;;  %v204_v23 = vand.u32 127, %v55_v10  ;;  %s860_s16 = smov [#allocation8]   ;;  %s861_s18 = smov [#allocation7]  }
  0x2a   :  { %s643_s17 = sshll.u32 %s860_s16, 4  ;;  %s631_s19 = sshll.u32 %s861_s18, 4  ;;  %s644_s17 = int_to_ptr.vmem [resolvable:$true] %s643_s17  ;;  %s1001_s19 = int_to_ptr.vmem [resolvable:$true] %s631_s19 }
  0x2b   :  { %v179_v12 = vsub.s32 4, %v929_v11  ;;  %v193_v13 = vsub.s32 5, %v929_v11  ;;  %vm211_vm0 = vcmp.lt.s32.totalorder %v204_v23, 84  ;;  %s862_s20 = smov [#allocation10]   ;;  %s774_s22 = scalar_lea.vmem %s644_s17, 128 }
  0x2c   :  { %s655_s21 = sshll.u32 %s862_s20, 4  ;;  %p775_p2 = scmp.ne.s32.totalorder %s644_s17, %s774_s22  ;;  %s1005_s21 = int_to_ptr.vmem [resolvable:$true] %s655_s21 }
  0x2d   :  { %159 = vrot.lane.b32.xlu0 %v921_v3, %s854_s14  ;;  %v180_v15 = vrot.slane %v933_v14, %v179_v12  ;;  %v194_v16 = vrot.slane %v933_v14, %v193_v13  ;;  %p779_p3 = scmp.lt.s32.totalorder %s644_s17, %s644_s17  ;;  %p780_p4 = scmp.lt.s32.totalorder %s774_s22, %s774_s22 }
  0x2f   :  { %p781_p5 = por %p780_p4, %p779_p3 }
  0x31   :  { %p782_p6 = pnand %p781_p5, %p775_p2 }
  0x9b   :  { %v158_v4 = vpop.permute.xlu0 %157 }
  0x9c   :  { %v163_v5 = vadd.f32 %v158_v4, %v918_v2 }
  0x9e   :  { %v165_v6 = vmul.f32 0.5, %v163_v5 }
  0x9f   :  { %v160_v7 = vpop.permute.xlu0 %159 }
  0xa0   :  { %v164_v8 = vadd.f32 %v160_v7, %v921_v3  ;;  %184 = vperm.xlu0 %699, %v165_v6   ;;  %169 = vperm.xlu1 %698, %v165_v6  }
  0xa2   :  { %v166_v9 = vmul.f32 0.5, %v164_v8 }
  0xa4   :  { %174 = vperm.xlu1 %698, %v166_v9   ;;  %702 = vset.pattern.permute.xlu0 %v853_v1 }
  0xa8   :  { %700 = vset.pattern.permute.xlu1 %v852_v0 }
  0xa9   :  { %188 = vperm.xlu1 %700, %v166_v9  }
  0xad   :  { %701 = vset.pattern.permute.xlu1 %v853_v1 }
 0x11f   :  { %v170_v17 = vpop.permute.xlu1 %169  ;;  %v185_v18 = vpop.permute.xlu0 %184 }
 0x120   :  { %v181_v19 = vsub.f32 %v170_v17, %v180_v15  ;;  %v195_v20 = vsub.f32 %v185_v18, %v194_v16 }
 0x122   :  { %v197_v21 = vmul.f32 %v181_v19, %v181_v19  ;;  %v199_v22 = vmul.f32 %v195_v20, %v195_v20 }
 0x123   :  { %v175_v24 = vpop.permute.xlu1 %174 }
 0x124   :  { %v201_v25 = vadd.f32 %v199_v22, %v197_v21  ;;  %v182_v27 = vsub.f32 %v175_v24, %v180_v15 }
 0x126   :  { %v207_v26 = vand.u32 4294967168, %v201_v25  ;;  %v198_v32 = vmul.f32 %v182_v27, %v182_v27 }
 0x128   :  { %v209_v28 = vor.u32 %v207_v26, %v204_v23  ;;  %v189_v29 = vpop.permute.xlu1 %188 }
 0x129   :  { %v196_v30 = vsub.f32 %v189_v29, %v194_v16 }
 0x12a   :  { %v937_v31 = vsel %vm211_vm0, %v209_v28, 2147483647 }
 0x12b   :  { %v200_v33 = vmul.f32 %v196_v30, %v196_v30  ;;  %v217_v34 = vshra.s32 %v937_v31, 16  ;;  %v216_v42 = vand.u32 65535, %v937_v31 }
 0x12d   :  { %v202_v35 = vadd.f32 %v200_v33, %v198_v32  ;;  %v219_v36 = vcvt.s32.f32 %v217_v34  ;;  %v218_v44 = vcvt.s32.f32 %v216_v42 }
 0x12f   :  { %v208_v37 = vand.u32 4294967168, %v202_v35  ;;  %220 = vmin.xlane.f32.xlu1 %v219_v36 }
 0x131   :  { %v210_v38 = vor.u32 %v208_v37, %v204_v23 }
 0x133   :  { %v940_v39 = vsel %vm211_vm0, %v210_v38, 2147483647 }
 0x134   :  { %v231_v40 = vshra.s32 %v940_v39, 16  ;;  %v230_v46 = vand.u32 65535, %v940_v39 }
 0x136   :  { %v233_v41 = vcvt.s32.f32 %v231_v40  ;;  %v232_v48 = vcvt.s32.f32 %v230_v46 }
 0x138   :  { %234 = vmin.xlane.f32.xlu0 %v233_v41 }
 0x1bc   :  { %v221_v43 = vpop.xlane.xlu1 %220 }
 0x1bd   :  { %vm222_vm1 = vcmp.eq.f32.partialorder %v219_v36, %v221_v43  ;;  %v227_v50 = vcvt.f32.s32 %v221_v43 }
 0x1be   :  { %v223_v45 = vsel %vm222_vm1, %v218_v44, inf }
 0x1bf   :  { %224 = vmin.xlane.f32.xlu0 %v223_v45  ;;  %v228_v52 = vshll.u32 %v227_v50, 16 }
 0x1c5   :  { %v235_v47 = vpop.xlane.xlu0 %234 }
 0x1c6   :  { %vm236_vm2 = vcmp.eq.f32.partialorder %v233_v41, %v235_v47  ;;  %v241_v55 = vcvt.f32.s32 %v235_v47 }
 0x1c7   :  { %v237_v49 = vsel %vm236_vm2, %v232_v48, inf }
 0x1c8   :  { %238 = vmin.xlane.f32.xlu1 %v237_v49  ;;  %v242_v60 = vshll.u32 %v241_v55, 16 }
 0x24c   :  { %v225_v51 = vpop.xlane.xlu0 %224 }
 0x24d   :  { %v226_v53 = vcvt.f32.s32 %v225_v51 }
 0x24f   :  { %v229_v54 = vadd.s32 %v228_v52, %v226_v53 }
 0x251   :  { %vm244_vm3 = vcmp.eq.s32.totalorder %v937_v31, %v229_v54 }
 0x252   :  { %v246_v56 = vsel %vm244_vm3, 2147483647, %v937_v31 }
 0x253   :  { %v249_v57 = vshra.s32 %v246_v56, 16  ;;  %v248_v6 = vand.u32 65535, %v246_v56 }
 0x255   :  { %v239_v58 = vpop.xlane.xlu1 %238  ;;  %v251_v59 = vcvt.s32.f32 %v249_v57  ;;  %v250_v8 = vcvt.s32.f32 %v248_v6 }
 0x256   :  { %v240_v61 = vcvt.f32.s32 %v239_v58 }
 0x257   :  { %252 = vmin.xlane.f32.xlu0 %v251_v59 }
 0x258   :  { %v243_v62 = vadd.s32 %v242_v60, %v240_v61 }
 0x25a   :  { %vm245_vm4 = vcmp.eq.s32.totalorder %v940_v39, %v243_v62 }
 0x25b   :  { %v247_v63 = vsel %vm245_vm4, 2147483647, %v940_v39 }
 0x25c   :  { %v263_v4 = vshra.s32 %v247_v63, 16  ;;  %v262_v10 = vand.u32 65535, %v247_v63 }
 0x25e   :  { %v265_v5 = vcvt.s32.f32 %v263_v4  ;;  %v264_v13 = vcvt.s32.f32 %v262_v10 }
 0x260   :  { %266 = vmin.xlane.f32.xlu1 %v265_v5 }
 0x2e4   :  { %v253_v7 = vpop.xlane.xlu0 %252 }
 0x2e5   :  { %vm254_vm5 = vcmp.eq.f32.partialorder %v251_v59, %v253_v7  ;;  %v259_v16 = vcvt.f32.s32 %v253_v7 }
 0x2e6   :  { %v255_v9 = vsel %vm254_vm5, %v250_v8, inf }
 0x2e7   :  { %256 = vmin.xlane.f32.xlu0 %v255_v9  ;;  %v260_v18 = vshll.u32 %v259_v16, 16 }
 0x2ed   :  { %v267_v12 = vpop.xlane.xlu1 %266 }
 0x2ee   :  { %vm268_vm6 = vcmp.eq.f32.partialorder %v265_v5, %v267_v12  ;;  %v273_v21 = vcvt.f32.s32 %v267_v12 }
 0x2ef   :  { %v269_v15 = vsel %vm268_vm6, %v264_v13, inf }
 0x2f0   :  { %270 = vmin.xlane.f32.xlu1 %v269_v15  ;;  %v274_v26 = vshll.u32 %v273_v21, 16 }
 0x374   :  { %v257_v17 = vpop.xlane.xlu0 %256 }
 0x375   :  { %v258_v19 = vcvt.f32.s32 %v257_v17 }
 0x377   :  { %v261_v20 = vadd.s32 %v260_v18, %v258_v19 }
 0x379   :  { %vm276_vm7 = vcmp.eq.s32.totalorder %v246_v56, %v261_v20 }
 0x37a   :  { %v278_v22 = vsel %vm276_vm7, 2147483647, %v246_v56 }
 0x37b   :  { %v281_v23 = vshra.s32 %v278_v22, 16  ;;  %v280_v33 = vand.u32 65535, %v278_v22 }
 0x37d   :  { %v271_v24 = vpop.xlane.xlu1 %270  ;;  %v283_v25 = vcvt.s32.f32 %v281_v23  ;;  %v282_v35 = vcvt.s32.f32 %v280_v33 }
 0x37e   :  { %v272_v27 = vcvt.f32.s32 %v271_v24 }
 0x37f   :  { %284 = vmin.xlane.f32.xlu0 %v283_v25 }
 0x380   :  { %v275_v28 = vadd.s32 %v274_v26, %v272_v27 }
 0x382   :  { %vm277_vm8 = vcmp.eq.s32.totalorder %v247_v63, %v275_v28 }
 0x383   :  { %v279_v29 = vsel %vm277_vm8, 2147483647, %v247_v63 }
 0x384   :  { %v295_v30 = vshra.s32 %v279_v29, 16  ;;  %v294_v37 = vand.u32 65535, %v279_v29 }
 0x386   :  { %v297_v32 = vcvt.s32.f32 %v295_v30  ;;  %v296_v40 = vcvt.s32.f32 %v294_v37 }
 0x388   :  { %298 = vmin.xlane.f32.xlu1 %v297_v32 }
 0x40c   :  { %v285_v34 = vpop.xlane.xlu0 %284 }
 0x40d   :  { %vm286_vm9 = vcmp.eq.f32.partialorder %v283_v25, %v285_v34  ;;  %v291_v42 = vcvt.f32.s32 %v285_v34 }
 0x40e   :  { %v287_v36 = vsel %vm286_vm9, %v282_v35, inf }
 0x40f   :  { %288 = vmin.xlane.f32.xlu0 %v287_v36  ;;  %v292_v44 = vshll.u32 %v291_v42, 16 }
 0x415   :  { %v299_v38 = vpop.xlane.xlu1 %298 }
 0x416   :  { %vm300_vm10 = vcmp.eq.f32.partialorder %v297_v32, %v299_v38  ;;  %v305_v47 = vcvt.f32.s32 %v299_v38 }
 0x417   :  { %v301_v41 = vsel %vm300_vm10, %v296_v40, inf }
 0x418   :  { %302 = vmin.xlane.f32.xlu1 %v301_v41  ;;  %v306_v52 = vshll.u32 %v305_v47, 16 }
 0x49c   :  { %v289_v43 = vpop.xlane.xlu0 %288 }
 0x49d   :  { %v290_v45 = vcvt.f32.s32 %v289_v43 }
 0x49f   :  { %v293_v46 = vadd.s32 %v292_v44, %v290_v45 }
 0x4a1   :  { %vm308_vm11 = vcmp.eq.s32.totalorder %v278_v22, %v293_v46 }
 0x4a2   :  { %v310_v48 = vsel %vm308_vm11, 2147483647, %v278_v22 }
 0x4a3   :  { %v313_v49 = vshra.s32 %v310_v48, 16  ;;  %v312_v58 = vand.u32 65535, %v310_v48 }
 0x4a5   :  { %v303_v50 = vpop.xlane.xlu1 %302  ;;  %v315_v51 = vcvt.s32.f32 %v313_v49  ;;  %v314_v60 = vcvt.s32.f32 %v312_v58 }
 0x4a6   :  { %v304_v53 = vcvt.f32.s32 %v303_v50 }
 0x4a7   :  { %316 = vmin.xlane.f32.xlu0 %v315_v51 }
 0x4a8   :  { %v307_v54 = vadd.s32 %v306_v52, %v304_v53 }
 0x4aa   :  { %vm309_vm12 = vcmp.eq.s32.totalorder %v279_v29, %v307_v54 }
 0x4ab   :  { %v311_v55 = vsel %vm309_vm12, 2147483647, %v279_v29 }
 0x4ac   :  { %v327_v56 = vshra.s32 %v311_v55, 16  ;;  %v326_v62 = vand.u32 65535, %v311_v55 }
 0x4ae   :  { %v329_v57 = vcvt.s32.f32 %v327_v56  ;;  %v328_v4 = vcvt.s32.f32 %v326_v62 }
 0x4b0   :  { %330 = vmin.xlane.f32.xlu1 %v329_v57 }
 0x534   :  { %v317_v59 = vpop.xlane.xlu0 %316 }
 0x535   :  { %vm318_vm13 = vcmp.eq.f32.partialorder %v315_v51, %v317_v59  ;;  %v323_v6 = vcvt.f32.s32 %v317_v59 }
 0x536   :  { %v319_v61 = vsel %vm318_vm13, %v314_v60, inf }
 0x537   :  { %320 = vmin.xlane.f32.xlu0 %v319_v61  ;;  %v324_v8 = vshll.u32 %v323_v6, 16 }
 0x53d   :  { %v331_v63 = vpop.xlane.xlu1 %330 }
 0x53e   :  { %vm332_vm14 = vcmp.eq.f32.partialorder %v329_v57, %v331_v63  ;;  %v337_v12 = vcvt.f32.s32 %v331_v63 }
 0x53f   :  { %v333_v5 = vsel %vm332_vm14, %v328_v4, inf }
 0x540   :  { %334 = vmin.xlane.f32.xlu1 %v333_v5  ;;  %v338_v18 = vshll.u32 %v337_v12, 16 }
 0x5c4   :  { %v321_v7 = vpop.xlane.xlu0 %320 }
 0x5c5   :  { %v322_v9 = vcvt.f32.s32 %v321_v7 }
 0x5c7   :  { %v325_v10 = vadd.s32 %v324_v8, %v322_v9 }
 0x5c9   :  { %vm340_vm15 = vcmp.eq.s32.totalorder %v310_v48, %v325_v10 }
 0x5ca   :  { %v342_v13 = vsel %vm340_vm15, 2147483647, %v310_v48 }
 0x5cb   :  { %v345_v15 = vshra.s32 %v342_v13, 16  ;;  %v344_v24 = vand.u32 65535, %v342_v13 }
 0x5cd   :  { %v335_v16 = vpop.xlane.xlu1 %334  ;;  %v347_v17 = vcvt.s32.f32 %v345_v15  ;;  %v346_v26 = vcvt.s32.f32 %v344_v24 }
 0x5ce   :  { %v336_v19 = vcvt.f32.s32 %v335_v16 }
 0x5cf   :  { %348 = vmin.xlane.f32.xlu0 %v347_v17 }
 0x5d0   :  { %v339_v20 = vadd.s32 %v338_v18, %v336_v19 }
 0x5d2   :  { %vm341_vm0 = vcmp.eq.s32.totalorder %v311_v55, %v339_v20 }
 0x5d3   :  { %v343_v21 = vsel %vm341_vm0, 2147483647, %v311_v55 }
 0x5d4   :  { %v359_v22 = vshra.s32 %v343_v21, 16  ;;  %v358_v28 = vand.u32 65535, %v343_v21 }
 0x5d6   :  { %v361_v23 = vcvt.s32.f32 %v359_v22  ;;  %v360_v30 = vcvt.s32.f32 %v358_v28 }
 0x5d8   :  { %362 = vmin.xlane.f32.xlu1 %v361_v23 }
 0x65c   :  { %v349_v25 = vpop.xlane.xlu0 %348 }
 0x65d   :  { %vm350_vm1 = vcmp.eq.f32.partialorder %v347_v17, %v349_v25  ;;  %v355_v33 = vcvt.f32.s32 %v349_v25 }
 0x65e   :  { %v351_v27 = vsel %vm350_vm1, %v346_v26, inf }
 0x65f   :  { %352 = vmin.xlane.f32.xlu0 %v351_v27  ;;  %v356_v35 = vshll.u32 %v355_v33, 16 }
 0x665   :  { %v363_v29 = vpop.xlane.xlu1 %362 }
 0x666   :  { %vm364_vm2 = vcmp.eq.f32.partialorder %v361_v23, %v363_v29  ;;  %v369_v38 = vcvt.f32.s32 %v363_v29 }
 0x667   :  { %v365_v32 = vsel %vm364_vm2, %v360_v30, inf }
 0x668   :  { %366 = vmin.xlane.f32.xlu1 %v365_v32  ;;  %v370_v44 = vshll.u32 %v369_v38, 16 }
 0x6ec   :  { %v353_v34 = vpop.xlane.xlu0 %352 }
 0x6ed   :  { %v354_v36 = vcvt.f32.s32 %v353_v34 }
 0x6ef   :  { %v357_v37 = vadd.s32 %v356_v35, %v354_v36 }
 0x6f1   :  { %vm372_vm3 = vcmp.eq.s32.totalorder %v342_v13, %v357_v37 }
 0x6f2   :  { %v374_v40 = vsel %vm372_vm3, 2147483647, %v342_v13 }
 0x6f3   :  { %v377_v41 = vshra.s32 %v374_v40, 16  ;;  %v376_v50 = vand.u32 65535, %v374_v40 }
 0x6f5   :  { %v367_v42 = vpop.xlane.xlu1 %366  ;;  %v379_v43 = vcvt.s32.f32 %v377_v41  ;;  %v378_v52 = vcvt.s32.f32 %v376_v50 }
 0x6f6   :  { %v368_v45 = vcvt.f32.s32 %v367_v42 }
 0x6f7   :  { %380 = vmin.xlane.f32.xlu0 %v379_v43 }
 0x6f8   :  { %v371_v46 = vadd.s32 %v370_v44, %v368_v45 }
 0x6fa   :  { %vm373_vm4 = vcmp.eq.s32.totalorder %v343_v21, %v371_v46 }
 0x6fb   :  { %v375_v47 = vsel %vm373_vm4, 2147483647, %v343_v21 }
 0x6fc   :  { %v391_v48 = vshra.s32 %v375_v47, 16  ;;  %v390_v54 = vand.u32 65535, %v375_v47 }
 0x6fe   :  { %v393_v49 = vcvt.s32.f32 %v391_v48  ;;  %v392_v56 = vcvt.s32.f32 %v390_v54  ;;  %v858_v54 = vmov 3  }
 0x700   :  { %394 = vmin.xlane.f32.xlu1 %v393_v49 }
 0x784   :  { %v381_v51 = vpop.xlane.xlu0 %380 }
 0x785   :  { %vm382_vm5 = vcmp.eq.f32.partialorder %v379_v43, %v381_v51  ;;  %v387_v58 = vcvt.f32.s32 %v381_v51 }
 0x786   :  { %v383_v53 = vsel %vm382_vm5, %v378_v52, inf }
 0x787   :  { %384 = vmin.xlane.f32.xlu0 %v383_v53  ;;  %v388_v60 = vshll.u32 %v387_v58, 16  ;;  %v857_v53 = vmov 2  }
 0x78d   :  { %v395_v55 = vpop.xlane.xlu1 %394 }
 0x78e   :  { %vm396_vm6 = vcmp.eq.f32.partialorder %v393_v49, %v395_v55  ;;  %v401_v63 = vcvt.f32.s32 %v395_v55 }
 0x78f   :  { %v397_v57 = vsel %vm396_vm6, %v392_v56, inf }
 0x790   :  { %398 = vmin.xlane.f32.xlu1 %v397_v57  ;;  %v402_v8 = vshll.u32 %v401_v63, 16 }
 0x814   :  { %v385_v59 = vpop.xlane.xlu0 %384 }
 0x815   :  { %v386_v61 = vcvt.f32.s32 %v385_v59 }
 0x817   :  { %v389_v62 = vadd.s32 %v388_v60, %v386_v61 }
 0x819   :  { %vm404_vm7 = vcmp.eq.s32.totalorder %v374_v40, %v389_v62 }
 0x81a   :  { %v406_v4 = vsel %vm404_vm7, 2147483647, %v374_v40 }
 0x81b   :  { %v409_v5 = vshra.s32 %v406_v4, 16  ;;  %v408_v16 = vand.u32 65535, %v406_v4 }
 0x81d   :  { %v399_v6 = vpop.xlane.xlu1 %398  ;;  %v411_v7 = vcvt.s32.f32 %v409_v5  ;;  %v410_v18 = vcvt.s32.f32 %v408_v16 }
 0x81e   :  { %v400_v9 = vcvt.f32.s32 %v399_v6 }
 0x81f   :  { %412 = vmin.xlane.f32.xlu0 %v411_v7 }
 0x820   :  { %v403_v10 = vadd.s32 %v402_v8, %v400_v9 }
 0x822   :  { %vm405_vm8 = vcmp.eq.s32.totalorder %v375_v47, %v403_v10 }
 0x823   :  { %v407_v12 = vsel %vm405_vm8, 2147483647, %v375_v47 }
 0x824   :  { %v423_v13 = vshra.s32 %v407_v12, 16  ;;  %v422_v20 = vand.u32 65535, %v407_v12 }
 0x826   :  { %v425_v15 = vcvt.s32.f32 %v423_v13  ;;  %v424_v22 = vcvt.s32.f32 %v422_v20 }
 0x828   :  { %426 = vmin.xlane.f32.xlu1 %v425_v15 }
 0x8ac   :  { %v413_v17 = vpop.xlane.xlu0 %412 }
 0x8ad   :  { %vm414_vm9 = vcmp.eq.f32.partialorder %v411_v7, %v413_v17  ;;  %v419_v24 = vcvt.f32.s32 %v413_v17 }
 0x8ae   :  { %v415_v19 = vsel %vm414_vm9, %v410_v18, inf  ;;  %vm613_vm9 = vcmask 679936  }
 0x8af   :  { %416 = vmin.xlane.f32.xlu0 %v415_v19  ;;  %v420_v26 = vshll.u32 %v419_v24, 16 }
 0x8b5   :  { %v427_v21 = vpop.xlane.xlu1 %426 }
 0x8b6   :  { %vm428_vm10 = vcmp.eq.f32.partialorder %v425_v15, %v427_v21  ;;  %v433_v29 = vcvt.f32.s32 %v427_v21 }
 0x8b7   :  { %v429_v23 = vsel %vm428_vm10, %v424_v22, inf }
 0x8b8   :  { %430 = vmin.xlane.f32.xlu1 %v429_v23  ;;  %v434_v35 = vshll.u32 %v433_v29, 16 }
 0x93c   :  { %v417_v25 = vpop.xlane.xlu0 %416 }
 0x93d   :  { %v418_v27 = vcvt.f32.s32 %v417_v25 }
 0x93f   :  { %v421_v28 = vadd.s32 %v420_v26, %v418_v27 }
 0x941   :  { %vm436_vm11 = vcmp.eq.s32.totalorder %v406_v4, %v421_v28 }
 0x942   :  { %v438_v30 = vsel %vm436_vm11, 2147483647, %v406_v4 }
 0x943   :  { %v441_v32 = vshra.s32 %v438_v30, 16  ;;  %v440_v42 = vand.u32 65535, %v438_v30 }
 0x945   :  { %v431_v33 = vpop.xlane.xlu1 %430  ;;  %v443_v34 = vcvt.s32.f32 %v441_v32  ;;  %v442_v44 = vcvt.s32.f32 %v440_v42  ;;  %v71_v32 = vsub.s32 1, %v929_v11 }
 0x946   :  { %v432_v36 = vcvt.f32.s32 %v431_v33  ;;  %v99_v33 = vsub.s32 3, %v929_v11 }
 0x947   :  { %444 = vmin.xlane.f32.xlu0 %v443_v34 }
 0x948   :  { %v435_v37 = vadd.s32 %v434_v35, %v432_v36  ;;  %v57_v35 = vsub.s32 0, %v929_v11 }
 0x94a   :  { %vm437_vm12 = vcmp.eq.s32.totalorder %v407_v12, %v435_v37  ;;  %v72_v37 = vrot.slane %v933_v14, %v71_v32 }
 0x94b   :  { %v439_v38 = vsel %vm437_vm12, 2147483647, %v407_v12 }
 0x94c   :  { %v455_v40 = vshra.s32 %v439_v38, 16  ;;  %v454_v46 = vand.u32 65535, %v439_v38 }
 0x94e   :  { %v457_v41 = vcvt.s32.f32 %v455_v40  ;;  %v456_v48 = vcvt.s32.f32 %v454_v46 }
 0x950   :  { %458 = vmin.xlane.f32.xlu1 %v457_v41 }
 0x95d   :  { %113 = vrot.lane.b32.xlu0 %v918_v2, %s855_s1 }
 0x9d4   :  { %v445_v43 = vpop.xlane.xlu0 %444 }
 0x9d5   :  { %vm446_vm13 = vcmp.eq.f32.partialorder %v443_v34, %v445_v43  ;;  %v451_v7 = vcvt.f32.s32 %v445_v43  ;;  %v85_v34 = vsub.s32 2, %v929_v11 }
 0x9d6   :  { %v447_v45 = vsel %vm446_vm13, %v442_v44, inf }
 0x9d7   :  { %448 = vmin.xlane.f32.xlu0 %v447_v45  ;;  %v452_v9 = vshll.u32 %v451_v7, 16  ;;  %v86_v40 = vrot.slane %v933_v14, %v85_v34 }
 0x9d8   :  { %v114_v50 = vpop.permute.xlu0 %113 }
 0x9d9   :  { %v119_v51 = vsub.f32 %v918_v2, %v114_v50 }
 0x9db   :  { %v121_v52 = vmax.f32 %v119_v51, 0.0 }
 0x9dd   :  { %v459_v47 = vpop.xlane.xlu1 %458 }
 0x9de   :  { %vm460_vm14 = vcmp.eq.f32.partialorder %v457_v41, %v459_v47  ;;  %v465_v55 = vcvt.f32.s32 %v459_v47  ;;  %v58_v41 = vrot.slane %v933_v14, %v57_v35  ;;  %v145_v47 = vsub.s32 6, %v929_v11 }
 0x9df   :  { %v461_v49 = vsel %vm460_vm14, %v456_v48, inf  ;;  %vm604_vm14 = vcmask 681984  }
 0x9e0   :  { %462 = vmin.xlane.f32.xlu1 %v461_v49  ;;  %v466_v57 = vshll.u32 %v465_v55, 16 }
 0x9ed   :  { %125 = vrot.lane.b32.xlu0 %v121_v52, %s856_s15 }
 0x9f1   :  { %115 = vrot.lane.b32.xlu1 %v921_v3, %s855_s1  ;;  %52 = vperm.xlu0 %702, %v921_v3  }
 0x9f5   :  { %704 = vset.pattern.permute.xlu0 %v857_v53 }
 0x9f6   :  { %76 = vperm.xlu0 %704, %v918_v2  }
 0x9fa   :  { %707 = vset.pattern.permute.xlu0 %v858_v54 }
 0xa64   :  { %v449_v6 = vpop.xlane.xlu0 %448 }
 0xa65   :  { %v450_v8 = vcvt.f32.s32 %v449_v6 }
 0xa67   :  { %v453_v10 = vadd.s32 %v452_v9, %v450_v8 }
 0xa68   :  { %v126_v16 = vpop.permute.xlu0 %125 }
 0xa69   :  { %vm468_vm0 = vcmp.eq.s32.totalorder %v438_v30, %v453_v10  ;;  %v131_v17 = vmul.f32 %v126_v16, %v121_v52 }
 0xa6a   :  { %v470_v12 = vsel %vm468_vm0, 2147483647, %v438_v30 }
 0xa6b   :  { %v473_v13 = vshra.s32 %v470_v12, 16  ;;  %v472_v25 = vand.u32 65535, %v470_v12 }
 0xa6d   :  { %v463_v56 = vpop.xlane.xlu1 %462  ;;  %v475_v15 = vcvt.s32.f32 %v473_v13  ;;  %v474_v26 = vcvt.s32.f32 %v472_v25 }
 0xa6e   :  { %v464_v58 = vcvt.f32.s32 %v463_v56 }
 0xa70   :  { %v467_v59 = vadd.s32 %v466_v57, %v464_v58  ;;  %v53_v20 = vpop.permute.xlu0 %52  ;;  %v146_v58 = vrot.slane %v933_v14, %v145_v47 }
 0xa71   :  { %v116_v60 = vpop.permute.xlu1 %115  ;;  %v60_v52 = vmax.f32 %v53_v20, %v58_v41 }
 0xa72   :  { %v120_v61 = vsub.f32 %v921_v3, %v116_v60  ;;  %vm469_vm15 = vcmp.eq.s32.totalorder %v439_v38, %v467_v59 }
 0xa73   :  { %v471_v62 = vsel %vm469_vm15, 2147483647, %v439_v38  ;;  %v100_v38 = vrot.slane %v933_v14, %v99_v33 }
 0xa74   :  { %v122_v63 = vmax.f32 %v120_v61, 0.0  ;;  %v487_v4 = vshra.s32 %v471_v62, 16  ;;  %v486_v22 = vand.u32 65535, %v471_v62 }
 0xa75   :  { %v77_v21 = vpop.permute.xlu0 %76 }
 0xa76   :  { %127 = vrot.lane.b32.xlu1 %v122_v63, %s856_s15  ;;  %v489_v5 = vcvt.s32.f32 %v487_v4  ;;  %v488_v23 = vcvt.s32.f32 %v486_v22  ;;  %v87_v46 = vmin.f32 %v77_v21, %v86_v40 }
 0xa78   :  { %490 = vmin.xlane.f32.xlu0 %v489_v5 }
 0xa8e   :  { %94 = vperm.xlu0 %707, %v921_v3  }
 0xa92   :  { %709 = vset.pattern.permute.xlu0 %v852_v0 }
 0xa9a   :  { %476 = vmin.xlane.f32.xlu1 %v475_v15 }
 0xaab   :  { %47 = vperm.xlu1 %701, %v918_v2  }
 0xaaf   :  { %703 = vset.pattern.permute.xlu1 %v852_v0 }
 0xab0   :  { %62 = vperm.xlu1 %703, %v918_v2  }
 0xab4   :  { %66 = vperm.xlu1 %703, %v921_v3  }
 0xab8   :  { %705 = vset.pattern.permute.xlu1 %v857_v53 }
 0xab9   :  { %80 = vperm.xlu1 %705, %v921_v3  }
 0xabd   :  { %706 = vset.pattern.permute.xlu1 %v858_v54 }
 0xabe   :  { %90 = vperm.xlu1 %706, %v918_v2  }
 0xac2   :  { %708 = vset.pattern.permute.xlu1 %v857_v53 }
 0xac3   :  { %135 = vperm.xlu1 %708, %v131_v17  }
 0xae8   :  { %v128_v18 = vpop.permute.xlu1 %127 }
 0xae9   :  { %v132_v19 = vmul.f32 %v128_v18, %v122_v63 }
 0xaeb   :  { %140 = vperm.xlu1 %708, %v132_v19  }
 0xb05   :  { %v491_v0 = vpop.xlane.xlu0 %490 }
 0xb06   :  { %vm492_vm1 = vcmp.eq.f32.partialorder %v489_v5, %v491_v0  ;;  %v497_v12 = vcvt.f32.s32 %v491_v0  ;;  %v859_v0 = vmov 0.0  }
 0xb07   :  { %v493_v24 = vsel %vm492_vm1, %v488_v23, inf }
 0xb08   :  { %v498_v14 = vshll.u32 %v497_v12, 16 }
 0xb0d   :  { %v95_v44 = vpop.permute.xlu0 %94 }
 0xb0e   :  { %v102_v50 = vmin.f32 %v95_v44, %v100_v38 }
 0xb0f   :  { %494 = vmin.xlane.f32.xlu1 %v493_v24 }
 0xb27   :  { %v477_v3 = vpop.xlane.xlu1 %476 }
 0xb28   :  { %vm478_vm2 = vcmp.eq.f32.partialorder %v475_v15, %v477_v3  ;;  %v483_v13 = vcvt.f32.s32 %v477_v3 }
 0xb29   :  { %v479_v27 = vsel %vm478_vm2, %v474_v26, inf }
 0xb2a   :  { %480 = vmin.xlane.f32.xlu0 %v479_v27  ;;  %v484_v19 = vshll.u32 %v483_v13, 16 }
 0xb2b   :  { %v48_v2 = vpop.permute.xlu1 %47 }
 0xb2c   :  { %v59_v45 = vmax.f32 %v48_v2, %v58_v41 }
 0xb2e   :  { %v103_v53 = vsub.f32 %v87_v46, %v59_v45 }
 0xb2f   :  { %v63_v28 = vpop.permute.xlu1 %62 }
 0xb30   :  { %v73_v42 = vmax.f32 %v63_v28, %v72_v37  ;;  %v105_v59 = vmax.f32 %v103_v53, 0.0 }
 0xb33   :  { %v67_v29 = vpop.permute.xlu1 %66 }
 0xb34   :  { %v74_v48 = vmax.f32 %v67_v29, %v72_v37 }
 0xb36   :  { %v108_v56 = vsub.f32 %v102_v50, %v74_v48 }
 0xb38   :  { %v81_v30 = vpop.permute.xlu1 %80  ;;  %v110_v62 = vmax.f32 %v108_v56, 0.0 }
 0xb39   :  { %v88_v49 = vmin.f32 %v81_v30, %v86_v40 }
 0xb3b   :  { %v104_v55 = vsub.f32 %v88_v49, %v60_v52 }
 0xb3d   :  { %v91_v36 = vpop.permute.xlu1 %90  ;;  %v106_v61 = vmax.f32 %v104_v55, 0.0 }
 0xb3e   :  { %v101_v43 = vmin.f32 %v91_v36, %v100_v38 }
 0xb3f   :  { %v112_v6 = vmul.f32 %v110_v62, %v106_v61 }
 0xb40   :  { %v107_v51 = vsub.f32 %v101_v43, %v73_v42 }
 0xb42   :  { %v136_v54 = vpop.permute.xlu1 %135  ;;  %v109_v57 = vmax.f32 %v107_v51, 0.0 }
 0xb43   :  { %v147_v4 = vadd.f32 %v146_v58, %v136_v54 }
 0xb44   :  { %v111_v63 = vmul.f32 %v109_v57, %v105_v59 }
 0xb46   :  { %v149_v11 = vsub.f32 %v147_v4, %v111_v63 }
 0xb48   :  { %v151_v8 = vadd.f32 1e-09, %v149_v11 }
 0xb4a   :  { %710 = vrcp.f32 %v151_v8 }
 0xb54   :  { %v711_v16 = vpop.eup %710 }
 0xb55   :  { %v973_v20 = vmul.f32 %v711_v16, %v111_v63 }
 0xb57   :  { %vm502_vm4 = vcmp.gt.f32.partialorder %v973_v20, 0.0 }
 0xb6a   :  { %v141_v60 = vpop.permute.xlu1 %140 }
 0xb6b   :  { %v148_v5 = vadd.f32 %v146_v58, %v141_v60 }
 0xb6d   :  { %v150_v7 = vsub.f32 %v148_v5, %v112_v6 }
 0xb6f   :  { %v152_v9 = vadd.f32 1e-09, %v150_v7 }
 0xb71   :  { %712 = vrcp.f32 %v152_v9 }
 0xb7b   :  { %v713_v17 = vpop.eup %712 }
 0xb7c   :  { %v975_v23 = vmul.f32 %v713_v17, %v112_v6 }
 0xb7e   :  { %vm503_vm7 = vcmp.gt.f32.partialorder %v975_v23, 0.0  ;;  %v617_v28 = vsel %vm613_vm9, %v975_v23, -inf }
 0xb9c   :  { %v495_v10 = vpop.xlane.xlu1 %494 }
 0xb9d   :  { %v496_v15 = vcvt.f32.s32 %v495_v10 }
 0xb9f   :  { %v499_v21 = vadd.s32 %v498_v14, %v496_v15 }
 0xba1   :  { %vm501_vm5 = vcmp.le.s32.totalorder %v940_v39, %v499_v21  ;;  %v614_v39 = vsel %vm613_vm9, %v973_v20, -inf }
 0xba2   :  { %vm505_vm8 = vmand %vm501_vm5, %vm503_vm7 }
 0xba3   :  { %v676_v27 = vsel %vm505_vm8, 1.0, %v859_v0 }
 0xbb7   :  { %v481_v18 = vpop.xlane.xlu0 %480 }
 0xbb8   :  { %v482_v22 = vcvt.f32.s32 %v481_v18 }
 0xbba   :  { %v485_v24 = vadd.s32 %v484_v19, %v482_v22 }
 0xbbc   :  { %vm500_vm3 = vcmp.le.s32.totalorder %v937_v31, %v485_v24  ;;  %v507_v31 = vsel %vm505_vm8, %v975_v23, 0.0 }
 0xbbd   :  { %vm504_vm6 = vmand %vm500_vm3, %vm502_vm4  ;;  %v513_v2 = vmul.f32 %v507_v31, %v507_v31 }
 0xbbe   :  { %v675_v25 = vsel %vm504_vm6, 1.0, %v859_v0  ;;  %v506_v3 = vsel %vm504_vm6, %v973_v20, 0.0 }
 0xbbf   :  { %522 = vadd.xlane.f32.xlu0 %v675_v25  ;;  %508 = vadd.xlane.f32.xlu1 %v506_v3  ;;  %v512_v26 = vmul.f32 %v506_v3, %v506_v3 }
 0xbc3   :  { %524 = vadd.xlane.f32.xlu0 %v676_v27  ;;  %514 = vadd.xlane.f32.xlu1 %v512_v26 }
 0xbc7   :  { %510 = vadd.xlane.f32.xlu0 %v507_v31  ;;  %615 = vmax.xlane.f32.xlu1 %v614_v39 }
 0xbcb   :  { %516 = vadd.xlane.f32.xlu0 %v513_v2 }
 0xbcf   :  { %618 = vmax.xlane.f32.xlu0 %v617_v28 }
 0xc4c   :  { %v523_v29 = vpop.xlane.xlu0 %522  ;;  %v509_v30 = vpop.xlane.xlu1 %508 }
 0xc4d   :  { %v550_v32 = vrot.slane %v523_v29, 4  ;;  %v526_v33 = vrot.slane %v509_v30, 4 }
 0xc4f   :  { %v551_v34 = vadd.f32 %v550_v32, %v523_v29  ;;  %v527_v35 = vadd.f32 %v526_v33, %v509_v30 }
 0xc50   :  { %v525_v36 = vpop.xlane.xlu0 %524  ;;  %v515_v37 = vpop.xlane.xlu1 %514 }
 0xc51   :  { %v552_v38 = vrot.slane %v551_v34, 2  ;;  %v556_v40 = vrot.slane %v525_v36, 4  ;;  %v538_v41 = vrot.slane %v515_v37, 4  ;;  %v528_v42 = vrot.slane %v527_v35, 2 }
 0xc53   :  { %v553_v43 = vadd.f32 %v552_v38, %v551_v34  ;;  %v557_v44 = vadd.f32 %v556_v40, %v525_v36  ;;  %v539_v45 = vadd.f32 %v538_v41, %v515_v37  ;;  %v529_v50 = vadd.f32 %v528_v42, %v527_v35 }
 0xc54   :  { %v511_v46 = vpop.xlane.xlu0 %510  ;;  %v616_v47 = vpop.xlane.xlu1 %615 }
 0xc55   :  { %v554_v48 = vrot.slane %v553_v43, 1  ;;  %v558_v49 = vrot.slane %v557_v44, 2  ;;  %v532_v51 = vrot.slane %v511_v46, 4  ;;  %714 = vrcp.f32 %v616_v47 }
 0xc56   :  { %v540_v54 = vrot.slane %v539_v45, 2  ;;  %v530_v58 = vrot.slane %v529_v50, 1 }
 0xc57   :  { %v555_v52 = vadd.f32 %v554_v48, %v553_v43  ;;  %v559_v53 = vadd.f32 %v558_v49, %v557_v44  ;;  %v533_v55 = vadd.f32 %v532_v51, %v511_v46 }
 0xc58   :  { %v517_v56 = vpop.xlane.xlu0 %516  ;;  %v541_v62 = vadd.f32 %v540_v54, %v539_v45  ;;  %v531_v6 = vadd.f32 %v530_v58, %v529_v50 }
 0xc59   :  { %716 = vrcp.f32 %v555_v52  ;;  %v677_v57 = vadd.f32 -1.0, %v555_v52  ;;  %v560_v59 = vrot.slane %v559_v53, 1  ;;  %v534_v60 = vrot.slane %v533_v55, 2 }
 0xc5a   :  { %v544_v61 = vrot.slane %v517_v56, 4  ;;  %v542_v12 = vrot.slane %v541_v62, 1  ;;  %v566_v16 = vmul.f32 %v531_v6, %v531_v6  ;;  %vm580_vm10 = vcmp.gt.f32.partialorder %v555_v52, 1.5 }
 0xc5b   :  { %718 = vrcp.f32 %v677_v57  ;;  %v561_v63 = vadd.f32 %v560_v59, %v559_v53  ;;  %v535_v4 = vadd.f32 %v534_v60, %v533_v55 }
 0xc5c   :  { %v545_v5 = vadd.f32 %v544_v61, %v517_v56  ;;  %v619_v11 = vpop.xlane.xlu0 %618  ;;  %v543_v19 = vadd.f32 %v542_v12, %v541_v62 }
 0xc5d   :  { %720 = vrcp.f32 %v619_v11  ;;  %v678_v7 = vadd.f32 -1.0, %v561_v63  ;;  %v536_v8 = vrot.slane %v535_v4, 1  ;;  %vm581_vm11 = vcmp.gt.f32.partialorder %v561_v63, 1.5 }
 0xc5e   :  { %722 = vrcp.f32 %v561_v63  ;;  %v546_v9 = vrot.slane %v545_v5, 2 }
 0xc5f   :  { %v715_v10 = vpop.eup %714  ;;  %724 = vrcp.f32 %v678_v7  ;;  %v537_v17 = vadd.f32 %v536_v8, %v535_v4 }
 0xc60   :  { %v621_v13 = vmul.f32 %v715_v10, %v973_v20  ;;  %v547_v15 = vadd.f32 %v546_v9, %v545_v5 }
 0xc61   :  { %v567_v25 = vmul.f32 %v537_v17, %v537_v17 }
 0xc62   :  { %624 = vst.msk [vmem:[#allocation10] sm:$0x1] %vm613_vm9, %v621_v13  ;;  %v548_v21 = vrot.slane %v547_v15, 1 }
 0xc63   :  { %v717_v14 = vpop.eup %716 }
 0xc64   :  { %v568_v18 = vmul.f32 %v717_v14, %v566_v16  ;;  %v549_v39 = vadd.f32 %v548_v21, %v547_v15  ;;  %v563_v38 = vmul.f32 %v717_v14, %v531_v6 }
 0xc65   :  { %v719_v22 = vpop.eup %718 }
 0xc66   :  { %v570_v24 = vsub.f32 %v543_v19, %v568_v18 }
 0xc67   :  { %v721_v0 = vpop.eup %720 }
 0xc68   :  { %v723_v3 = vpop.eup %722  ;;  %v575_v26 = vmul.f32 %v719_v22, %v570_v24  ;;  %v623_v27 = vmul.f32 %v721_v0, %v975_v23 }
 0xc69   :  { %v569_v31 = vmul.f32 %v723_v3, %v567_v25  ;;  %v725_v29 = vpop.eup %724  ;;  %v565_v44 = vmul.f32 %v723_v3, %v537_v17 }
 0xc6a   :  { %v578_v2 = vmax.f32 %v575_v26, 0.0  ;;  %625 = vst.msk [vmem:[#allocation10 + $0x1] sm:$0x1] %vm613_vm9, %v623_v27 }
 0xc6b   :  { %v571_v28 = vsub.f32 %v549_v39, %v569_v31 }
 0xc6c   :  { %v582_v30 = vsel %vm580_vm10, %v578_v2, nan }
 0xc6d   :  { %726 = vrsqrt.f32 %v582_v30  ;;  %v577_v32 = vmul.f32 %v725_v29, %v571_v28  ;;  %vm586_vm12 = vcmp.eq.f32.partialorder %v582_v30, inf  ;;  %v589_v37 = vand.u32 2147483648, %v582_v30 }
 0xc6e   :  { %vm588_vm13 = vcmp.eq.f32.partialorder %v582_v30, 0.0 }
 0xc6f   :  { %v579_v33 = vmax.f32 %v577_v32, 0.0 }
 0xc71   :  { %v583_v34 = vsel %vm581_vm11, %v579_v33, nan }
 0xc72   :  { %728 = vrsqrt.f32 %v583_v34  ;;  %vm593_vm15 = vcmp.eq.f32.partialorder %v583_v34, inf  ;;  %v596_v46 = vand.u32 2147483648, %v583_v34  ;;  %vm595_vm2 = vcmp.eq.f32.partialorder %v583_v34, 0.0 }
 0xc77   :  { %v727_v35 = vpop.eup %726 }
 0xc78   :  { %v585_v36 = vmul.f32 %v727_v35, %v582_v30 }
 0xc7a   :  { %v587_v40 = vsel %vm586_vm12, %v582_v30, %v585_v36 }
 0xc7b   :  { %v590_v41 = vsel %vm588_vm13, %v589_v37, %v587_v40 }
 0xc7c   :  { %v729_v42 = vpop.eup %728  ;;  %v598_v43 = vadd.f32 %v590_v41, %v563_v38 }
 0xc7d   :  { %v592_v45 = vmul.f32 %v729_v42, %v583_v34 }
 0xc7e   :  { %vm607_vm0 = vcmp.lt.f32.partialorder %v973_v20, %v598_v43  ;;  %vm600_vm1 = vcmp.gt.f32.partialorder %v973_v20, %v598_v43 }
 0xc7f   :  { %v594_v47 = vsel %vm593_vm15, %v583_v34, %v592_v45  ;;  %v609_v48 = vsel %vm607_vm0, 1, %v853_v1  ;;  %v602_v49 = vsel %vm600_vm1, 1, %v853_v1 }
 0xc80   :  { %v597_v50 = vsel %vm595_vm2, %v596_v46, %v594_v47  ;;  %611 = vst.msk [vmem:[#allocation8] sm:$0x7] %vm604_vm14, %v609_v48  ;;  %605 = vst.msk [vmem:[#allocation7] sm:$0x7] %vm604_vm14, %v602_v49 }
 0xc81   :  { %v599_v51 = vadd.f32 %v597_v50, %v565_v44 }
 0xc83   :  { %vm608_vm3 = vcmp.lt.f32.partialorder %v975_v23, %v599_v51  ;;  %vm601_vm4 = vcmp.gt.f32.partialorder %v975_v23, %v599_v51 }
 0xc84   :  { %v610_v20 = vsel %vm608_vm3, 1, %v853_v1  ;;  %v603_v52 = vsel %vm601_vm4, 1, %v853_v1 }
 0xc85   :  { %612 = vst.msk [vmem:[#allocation8 + $0x4] sm:$0x7] %vm604_vm14, %v610_v20  ;;  %606 = vst.msk [vmem:[#allocation7 + $0x4] sm:$0x7] %vm604_vm14, %v603_v52 }
 0xc86   :  { %785 = shalt.err (!%p782_p6)
}
 0xc87   :  { %s786_s25 = scalar_lea.hbm %s1056_s3, 128 }
 0xc88   :  { %p787_p7 = scmp.ne.s32.totalorder %s1056_s3, %s786_s25  ;;  %p790_p8 = scmp.lt.u32.totalorder %s786_s25, %s1056_s3 }
 0xc8a   :  { %p792_p9 = pnand %p790_p8, %p787_p7 }
 0xc8c   :  { %795 = shalt.err (!%p792_p9)
}
 0xc8d   :  { %s863_s30 = smov 64   ;;  %s864_s5 = smov 4  }
 0xc8e   :  { %649 = dma.vmem_to_hbm [thread:$0]  %s644_s17, 128, %s1056_s3, [#allocation9], %s863_s30, %s863_s30, %s864_s5  }
 0xc8f   :  { %s796_s8 = scalar_lea.vmem %s1001_s19, 128  ;;  %p801_p11 = scmp.lt.s32.totalorder %s1001_s19, %s1001_s19 }
 0xc90   :  { %p797_p10 = scmp.ne.s32.totalorder %s1001_s19, %s796_s8  ;;  %p802_p12 = scmp.lt.s32.totalorder %s796_s8, %s796_s8 }
 0xc92   :  { %p803_p13 = por %p802_p12, %p801_p11 }
 0xc94   :  { %p804_p0 = pnand %p803_p13, %p797_p10 }
 0xc96   :  { %807 = shalt.err (!%p804_p0)
}
 0xc97   :  { %s808_s11 = scalar_lea.hbm %s1055_s2, 128 }
 0xc98   :  { %p809_p1 = scmp.ne.s32.totalorder %s1055_s2, %s808_s11  ;;  %p812_p2 = scmp.lt.u32.totalorder %s808_s11, %s1055_s2 }
 0xc9a   :  { %p814_p3 = pnand %p812_p2, %p809_p1 }
 0xc9c   :  { %817 = shalt.err (!%p814_p3)
}
 0xc9d   :  { %637 = dma.vmem_to_hbm [thread:$0]  %s1001_s19, 128, %s1055_s2, [#allocation4], %s863_s30, %s863_s30, %s864_s5  }
 0xc9e   :  { %s818_s15 = scalar_lea.vmem %s1005_s21, 32  ;;  %p823_p5 = scmp.lt.s32.totalorder %s1005_s21, %s1005_s21 }
 0xc9f   :  { %p819_p4 = scmp.ne.s32.totalorder %s1005_s21, %s818_s15  ;;  %p824_p6 = scmp.lt.s32.totalorder %s818_s15, %s818_s15 }
 0xca1   :  { %p825_p7 = por %p824_p6, %p823_p5 }
 0xca3   :  { %p826_p8 = pnand %p825_p7, %p819_p4 }
 0xca5   :  { %829 = shalt.err (!%p826_p8)
}
 0xca6   :  { %s830_s18 = scalar_lea.hbm %s1057_s4, 32 }
 0xca7   :  { %p831_p9 = scmp.ne.s32.totalorder %s1057_s4, %s830_s18  ;;  %p834_p10 = scmp.lt.u32.totalorder %s830_s18, %s1057_s4 }
 0xca9   :  { %p836_p11 = pnand %p834_p10, %p831_p9 }
 0xcab   :  { %839 = shalt.err (!%p836_p11)
}
 0xcac   :  { %s865_s2 = smov 16   ;;  %s866_s19 = smov 1  }
 0xcad   :  { %661 = dma.vmem_to_hbm [thread:$0]  %s1005_s21, 32, %s1057_s4, [#allocation9], %s865_s2, %s865_s2, %s866_s19  }
 0xcae   :  { %844 = dma.done.wait [#allocation4], 128  }
 0xcaf   :  { %845 = vsyncadd [#allocation4], 4294967168 }
 0xcb0   :  { %846 = dma.done.wait [#allocation9], 160  }
 0xcb1   :  { %847 = vsyncadd [#allocation9], 4294967136 }
 0xcb2   :  { %671 = vsyncpa [#allocation3], 1 }
 0xcb3   :  { %672 = vsyncpa [#allocation6], 1 }
 0xcb4   :  { %673 = vsyncpa [#allocation4], 1 }
 0xcb5   :  { %674 = vsyncpa [#allocation9], 1 }

// kernel: tpu_custom_call.1
= control target key start
LH: loop header
LB: loop body
LE: loop exit
PB: predicated region body
PF: predicated region fallthrough
CT: control target
= control target key end

     0   :  { %10 = vsyncpa [#allocation3], 0  ;;  %s1087_s0 = inlined_call_operand.hbm [shape: f32[2,8,4], index: 0, kind: input, shape index: {}]   ;;  %s1088_s1 = inlined_call_operand.hbm [shape: f32[8,128], index: 1, kind: input, shape index: {}]   ;;  %s1089_s2 = inlined_call_operand.hbm [shape: s8[2,3,84], index: 2, kind: output, shape index: {0}]   ;;  %s1090_s3 = inlined_call_operand.hbm [shape: s8[2,3,84], index: 3, kind: output, shape index: {1}]   ;;  %s1091_s4 = inlined_call_operand.hbm [shape: f32[2,1,84], index: 4, kind: output, shape index: {2}]  }
   0x1   :  { %11 = vsyncpa [#allocation6], 0 }
   0x2   :  { %12 = vsyncpa [#allocation4], 0 }
   0x3   :  { %13 = vsyncpa [#allocation9], 0  ;;  %s866_s15 = smov [#allocation2]   ;;  %s748_s19 = scalar_lea.hbm %s1087_s0, 256 }
   0x4   :  { %s19_s16 = sshll.u32 %s866_s15, 4  ;;  %p749_p0 = scmp.ne.s32.totalorder %s1087_s0, %s748_s19  ;;  %s20_s16 = int_to_ptr.vmem [resolvable:$true] %s19_s16 }
   0x5   :  { %p752_p1 = scmp.lt.u32.totalorder %s748_s19, %s1087_s0 }
   0x7   :  { %p754_p2 = pnand %p752_p1, %p749_p0 }
   0x9   :  { %757 = shalt.err (!%p754_p2)
}
   0xa   :  { %s758_s24 = scalar_lea.vmem %s20_s16, 256  ;;  %p763_p4 = scmp.lt.s32.totalorder %s20_s16, %s20_s16 }
   0xb   :  { %p759_p3 = scmp.ne.s32.totalorder %s20_s16, %s758_s24  ;;  %p764_p5 = scmp.lt.s32.totalorder %s758_s24, %s758_s24 }
   0xd   :  { %p765_p6 = por %p764_p5, %p763_p4 }
   0xf   :  { %p766_p7 = pnand %p765_p6, %p759_p3 }
  0x11   :  { %769 = shalt.err (!%p766_p7)
}
  0x12   :  { %s867_s25 = smov 128   ;;  %s868_s26 = smov 8  }
  0x13   :  { %25 = dma.hbm_to_vmem [thread:$0]  %s1087_s0, 256, %s20_s16, [#allocation3], %s867_s25, %s867_s25, %s868_s26  }
  0x14   :  { %s869_s29 = smov [#allocation5]   ;;  %s770_s7 = scalar_lea.hbm %s1088_s1, 128 }
  0x15   :  { %s32_s30 = sshll.u32 %s869_s29, 4  ;;  %p771_p8 = scmp.ne.s32.totalorder %s1088_s1, %s770_s7  ;;  %s33_s30 = int_to_ptr.vmem [resolvable:$true] %s32_s30 }
  0x16   :  { %p774_p9 = scmp.lt.u32.totalorder %s770_s7, %s1088_s1 }
  0x18   :  { %p776_p10 = pnand %p774_p9, %p771_p8 }
  0x1a   :  { %779 = shalt.err (!%p776_p10)
}
  0x1b   :  { %s780_s12 = scalar_lea.vmem %s33_s30, 128  ;;  %p785_p12 = scmp.lt.s32.totalorder %s33_s30, %s33_s30 }
  0x1c   :  { %p781_p11 = scmp.ne.s32.totalorder %s33_s30, %s780_s12  ;;  %p786_p13 = scmp.lt.s32.totalorder %s780_s12, %s780_s12 }
  0x1e   :  { %p787_p0 = por %p786_p13, %p785_p12 }
  0x20   :  { %p788_p1 = pnand %p787_p0, %p781_p11 }
  0x22   :  { %791 = shalt.err (!%p788_p1)
}
  0x23   :  { %35 = dma.hbm_to_vmem [thread:$0]  %s1088_s1, 128, %s33_s30, [#allocation6]  }
  0x24   :  { %858 = dma.done.wait [#allocation3], 256  }
  0x25   :  { %859 = vsyncadd [#allocation3], 4294967040 }
  0x26   :  { %860 = dma.done.wait [#allocation6], 128  }
  0x27   :  { %861 = vsyncadd [#allocation6], 4294967168  ;;  %v870_v0 = vmov 1   ;;  %v871_v1 = vmov 0   ;;  %v934_v2 = vld [vmem:[#allocation2] sm:$0xff]  ;;  %s872_s14 = smov 126   ;;  %v57_v10 = vlaneseq }
  0x28   :  { %717 = vset.pattern.permute.xlu0 %v870_v0  ;;  %716 = vset.pattern.permute.xlu1 %v871_v1  ;;  %v937_v3 = vld [vmem:[#allocation2 + $0x8] sm:$0xff]  ;;  %v949_v14 = vld [vmem:[#allocation5] sm:$0xff]  ;;  %s873_s1 = smov 2   ;;  %s874_s15 = smov 127  }
  0x29   :  { %159 = vrot.lane.b32.xlu0 %v934_v2, %s872_s14  ;;  %v945_v11 = vshrl.u32 %v57_v10, 7  ;;  %v206_v23 = vand.u32 127, %v57_v10  ;;  %s878_s16 = smov [#allocation8]   ;;  %s879_s18 = smov [#allocation10]  }
  0x2a   :  { %s663_s17 = sshll.u32 %s878_s16, 4  ;;  %s675_s19 = sshll.u32 %s879_s18, 4  ;;  %s664_s17 = int_to_ptr.vmem [resolvable:$true] %s663_s17  ;;  %s1025_s19 = int_to_ptr.vmem [resolvable:$true] %s675_s19 }
  0x2b   :  { %v181_v12 = vsub.s32 4, %v945_v11  ;;  %v195_v13 = vsub.s32 5, %v945_v11  ;;  %vm213_vm0 = vcmp.lt.s32.totalorder %v206_v23, 84  ;;  %s880_s20 = smov [#allocation7]   ;;  %s792_s22 = scalar_lea.vmem %s664_s17, 32 }
  0x2c   :  { %s651_s21 = sshll.u32 %s880_s20, 4  ;;  %p793_p2 = scmp.ne.s32.totalorder %s664_s17, %s792_s22  ;;  %s1028_s21 = int_to_ptr.vmem [resolvable:$true] %s651_s21 }
  0x2d   :  { %161 = vrot.lane.b32.xlu0 %v937_v3, %s872_s14  ;;  %v182_v15 = vrot.slane %v949_v14, %v181_v12  ;;  %v196_v16 = vrot.slane %v949_v14, %v195_v13  ;;  %p797_p3 = scmp.lt.s32.totalorder %s664_s17, %s664_s17  ;;  %p798_p4 = scmp.lt.s32.totalorder %s792_s22, %s792_s22 }
  0x2f   :  { %p799_p5 = por %p798_p4, %p797_p3 }
  0x31   :  { %p800_p6 = pnand %p799_p5, %p793_p2 }
  0x9b   :  { %v160_v4 = vpop.permute.xlu0 %159 }
  0x9c   :  { %v165_v5 = vadd.f32 %v160_v4, %v934_v2 }
  0x9e   :  { %v167_v6 = vmul.f32 0.5, %v165_v5 }
  0x9f   :  { %v162_v7 = vpop.permute.xlu0 %161 }
  0xa0   :  { %v166_v8 = vadd.f32 %v162_v7, %v937_v3  ;;  %186 = vperm.xlu0 %717, %v167_v6   ;;  %171 = vperm.xlu1 %716, %v167_v6  }
  0xa2   :  { %v168_v9 = vmul.f32 0.5, %v166_v8 }
  0xa4   :  { %176 = vperm.xlu1 %716, %v168_v9   ;;  %720 = vset.pattern.permute.xlu0 %v871_v1 }
  0xa8   :  { %718 = vset.pattern.permute.xlu1 %v870_v0 }
  0xa9   :  { %190 = vperm.xlu1 %718, %v168_v9  }
  0xad   :  { %719 = vset.pattern.permute.xlu1 %v871_v1 }
 0x11f   :  { %v172_v17 = vpop.permute.xlu1 %171  ;;  %v187_v18 = vpop.permute.xlu0 %186 }
 0x120   :  { %v183_v19 = vsub.f32 %v172_v17, %v182_v15  ;;  %v197_v20 = vsub.f32 %v187_v18, %v196_v16 }
 0x122   :  { %v199_v21 = vmul.f32 %v183_v19, %v183_v19  ;;  %v201_v22 = vmul.f32 %v197_v20, %v197_v20 }
 0x123   :  { %v177_v24 = vpop.permute.xlu1 %176 }
 0x124   :  { %v203_v25 = vadd.f32 %v201_v22, %v199_v21  ;;  %v184_v27 = vsub.f32 %v177_v24, %v182_v15 }
 0x126   :  { %v209_v26 = vand.u32 4294967168, %v203_v25  ;;  %v200_v32 = vmul.f32 %v184_v27, %v184_v27 }
 0x128   :  { %v211_v28 = vor.u32 %v209_v26, %v206_v23  ;;  %v191_v29 = vpop.permute.xlu1 %190 }
 0x129   :  { %v198_v30 = vsub.f32 %v191_v29, %v196_v16 }
 0x12a   :  { %v953_v31 = vsel %vm213_vm0, %v211_v28, 2147483647 }
 0x12b   :  { %v202_v33 = vmul.f32 %v198_v30, %v198_v30  ;;  %v219_v34 = vshra.s32 %v953_v31, 16  ;;  %v218_v42 = vand.u32 65535, %v953_v31 }
 0x12d   :  { %v204_v35 = vadd.f32 %v202_v33, %v200_v32  ;;  %v221_v36 = vcvt.s32.f32 %v219_v34  ;;  %v220_v44 = vcvt.s32.f32 %v218_v42 }
 0x12f   :  { %v210_v37 = vand.u32 4294967168, %v204_v35  ;;  %222 = vmin.xlane.f32.xlu1 %v221_v36 }
 0x131   :  { %v212_v38 = vor.u32 %v210_v37, %v206_v23 }
 0x133   :  { %v956_v39 = vsel %vm213_vm0, %v212_v38, 2147483647 }
 0x134   :  { %v233_v40 = vshra.s32 %v956_v39, 16  ;;  %v232_v46 = vand.u32 65535, %v956_v39 }
 0x136   :  { %v235_v41 = vcvt.s32.f32 %v233_v40  ;;  %v234_v48 = vcvt.s32.f32 %v232_v46 }
 0x138   :  { %236 = vmin.xlane.f32.xlu0 %v235_v41 }
 0x1bc   :  { %v223_v43 = vpop.xlane.xlu1 %222 }
 0x1bd   :  { %vm224_vm1 = vcmp.eq.f32.partialorder %v221_v36, %v223_v43  ;;  %v229_v50 = vcvt.f32.s32 %v223_v43 }
 0x1be   :  { %v225_v45 = vsel %vm224_vm1, %v220_v44, inf }
 0x1bf   :  { %226 = vmin.xlane.f32.xlu0 %v225_v45  ;;  %v230_v52 = vshll.u32 %v229_v50, 16 }
 0x1c5   :  { %v237_v47 = vpop.xlane.xlu0 %236 }
 0x1c6   :  { %vm238_vm2 = vcmp.eq.f32.partialorder %v235_v41, %v237_v47  ;;  %v243_v55 = vcvt.f32.s32 %v237_v47 }
 0x1c7   :  { %v239_v49 = vsel %vm238_vm2, %v234_v48, inf }
 0x1c8   :  { %240 = vmin.xlane.f32.xlu1 %v239_v49  ;;  %v244_v60 = vshll.u32 %v243_v55, 16 }
 0x24c   :  { %v227_v51 = vpop.xlane.xlu0 %226 }
 0x24d   :  { %v228_v53 = vcvt.f32.s32 %v227_v51 }
 0x24f   :  { %v231_v54 = vadd.s32 %v230_v52, %v228_v53 }
 0x251   :  { %vm246_vm3 = vcmp.eq.s32.totalorder %v953_v31, %v231_v54 }
 0x252   :  { %v248_v56 = vsel %vm246_vm3, 2147483647, %v953_v31 }
 0x253   :  { %v251_v57 = vshra.s32 %v248_v56, 16  ;;  %v250_v6 = vand.u32 65535, %v248_v56 }
 0x255   :  { %v241_v58 = vpop.xlane.xlu1 %240  ;;  %v253_v59 = vcvt.s32.f32 %v251_v57  ;;  %v252_v8 = vcvt.s32.f32 %v250_v6 }
 0x256   :  { %v242_v61 = vcvt.f32.s32 %v241_v58 }
 0x257   :  { %254 = vmin.xlane.f32.xlu0 %v253_v59 }
 0x258   :  { %v245_v62 = vadd.s32 %v244_v60, %v242_v61 }
 0x25a   :  { %vm247_vm4 = vcmp.eq.s32.totalorder %v956_v39, %v245_v62 }
 0x25b   :  { %v249_v63 = vsel %vm247_vm4, 2147483647, %v956_v39 }
 0x25c   :  { %v265_v4 = vshra.s32 %v249_v63, 16  ;;  %v264_v10 = vand.u32 65535, %v249_v63 }
 0x25e   :  { %v267_v5 = vcvt.s32.f32 %v265_v4  ;;  %v266_v13 = vcvt.s32.f32 %v264_v10 }
 0x260   :  { %268 = vmin.xlane.f32.xlu1 %v267_v5 }
 0x2e4   :  { %v255_v7 = vpop.xlane.xlu0 %254 }
 0x2e5   :  { %vm256_vm5 = vcmp.eq.f32.partialorder %v253_v59, %v255_v7  ;;  %v261_v16 = vcvt.f32.s32 %v255_v7 }
 0x2e6   :  { %v257_v9 = vsel %vm256_vm5, %v252_v8, inf }
 0x2e7   :  { %258 = vmin.xlane.f32.xlu0 %v257_v9  ;;  %v262_v18 = vshll.u32 %v261_v16, 16 }
 0x2ed   :  { %v269_v12 = vpop.xlane.xlu1 %268 }
 0x2ee   :  { %vm270_vm6 = vcmp.eq.f32.partialorder %v267_v5, %v269_v12  ;;  %v275_v21 = vcvt.f32.s32 %v269_v12 }
 0x2ef   :  { %v271_v15 = vsel %vm270_vm6, %v266_v13, inf }
 0x2f0   :  { %272 = vmin.xlane.f32.xlu1 %v271_v15  ;;  %v276_v26 = vshll.u32 %v275_v21, 16 }
 0x374   :  { %v259_v17 = vpop.xlane.xlu0 %258 }
 0x375   :  { %v260_v19 = vcvt.f32.s32 %v259_v17 }
 0x377   :  { %v263_v20 = vadd.s32 %v262_v18, %v260_v19 }
 0x379   :  { %vm278_vm7 = vcmp.eq.s32.totalorder %v248_v56, %v263_v20 }
 0x37a   :  { %v280_v22 = vsel %vm278_vm7, 2147483647, %v248_v56 }
 0x37b   :  { %v283_v23 = vshra.s32 %v280_v22, 16  ;;  %v282_v33 = vand.u32 65535, %v280_v22 }
 0x37d   :  { %v273_v24 = vpop.xlane.xlu1 %272  ;;  %v285_v25 = vcvt.s32.f32 %v283_v23  ;;  %v284_v35 = vcvt.s32.f32 %v282_v33 }
 0x37e   :  { %v274_v27 = vcvt.f32.s32 %v273_v24 }
 0x37f   :  { %286 = vmin.xlane.f32.xlu0 %v285_v25 }
 0x380   :  { %v277_v28 = vadd.s32 %v276_v26, %v274_v27 }
 0x382   :  { %vm279_vm8 = vcmp.eq.s32.totalorder %v249_v63, %v277_v28 }
 0x383   :  { %v281_v29 = vsel %vm279_vm8, 2147483647, %v249_v63 }
 0x384   :  { %v297_v30 = vshra.s32 %v281_v29, 16  ;;  %v296_v37 = vand.u32 65535, %v281_v29 }
 0x386   :  { %v299_v32 = vcvt.s32.f32 %v297_v30  ;;  %v298_v40 = vcvt.s32.f32 %v296_v37 }
 0x388   :  { %300 = vmin.xlane.f32.xlu1 %v299_v32 }
 0x40c   :  { %v287_v34 = vpop.xlane.xlu0 %286 }
 0x40d   :  { %vm288_vm9 = vcmp.eq.f32.partialorder %v285_v25, %v287_v34  ;;  %v293_v42 = vcvt.f32.s32 %v287_v34 }
 0x40e   :  { %v289_v36 = vsel %vm288_vm9, %v284_v35, inf }
 0x40f   :  { %290 = vmin.xlane.f32.xlu0 %v289_v36  ;;  %v294_v44 = vshll.u32 %v293_v42, 16 }
 0x415   :  { %v301_v38 = vpop.xlane.xlu1 %300 }
 0x416   :  { %vm302_vm10 = vcmp.eq.f32.partialorder %v299_v32, %v301_v38  ;;  %v307_v47 = vcvt.f32.s32 %v301_v38 }
 0x417   :  { %v303_v41 = vsel %vm302_vm10, %v298_v40, inf }
 0x418   :  { %304 = vmin.xlane.f32.xlu1 %v303_v41  ;;  %v308_v52 = vshll.u32 %v307_v47, 16 }
 0x49c   :  { %v291_v43 = vpop.xlane.xlu0 %290 }
 0x49d   :  { %v292_v45 = vcvt.f32.s32 %v291_v43 }
 0x49f   :  { %v295_v46 = vadd.s32 %v294_v44, %v292_v45 }
 0x4a1   :  { %vm310_vm11 = vcmp.eq.s32.totalorder %v280_v22, %v295_v46 }
 0x4a2   :  { %v312_v48 = vsel %vm310_vm11, 2147483647, %v280_v22 }
 0x4a3   :  { %v315_v49 = vshra.s32 %v312_v48, 16  ;;  %v314_v58 = vand.u32 65535, %v312_v48 }
 0x4a5   :  { %v305_v50 = vpop.xlane.xlu1 %304  ;;  %v317_v51 = vcvt.s32.f32 %v315_v49  ;;  %v316_v60 = vcvt.s32.f32 %v314_v58 }
 0x4a6   :  { %v306_v53 = vcvt.f32.s32 %v305_v50 }
 0x4a7   :  { %318 = vmin.xlane.f32.xlu0 %v317_v51 }
 0x4a8   :  { %v309_v54 = vadd.s32 %v308_v52, %v306_v53 }
 0x4aa   :  { %vm311_vm12 = vcmp.eq.s32.totalorder %v281_v29, %v309_v54 }
 0x4ab   :  { %v313_v55 = vsel %vm311_vm12, 2147483647, %v281_v29 }
 0x4ac   :  { %v329_v56 = vshra.s32 %v313_v55, 16  ;;  %v328_v62 = vand.u32 65535, %v313_v55 }
 0x4ae   :  { %v331_v57 = vcvt.s32.f32 %v329_v56  ;;  %v330_v4 = vcvt.s32.f32 %v328_v62 }
 0x4b0   :  { %332 = vmin.xlane.f32.xlu1 %v331_v57 }
 0x534   :  { %v319_v59 = vpop.xlane.xlu0 %318 }
 0x535   :  { %vm320_vm13 = vcmp.eq.f32.partialorder %v317_v51, %v319_v59  ;;  %v325_v6 = vcvt.f32.s32 %v319_v59 }
 0x536   :  { %v321_v61 = vsel %vm320_vm13, %v316_v60, inf }
 0x537   :  { %322 = vmin.xlane.f32.xlu0 %v321_v61  ;;  %v326_v8 = vshll.u32 %v325_v6, 16 }
 0x53d   :  { %v333_v63 = vpop.xlane.xlu1 %332 }
 0x53e   :  { %vm334_vm14 = vcmp.eq.f32.partialorder %v331_v57, %v333_v63  ;;  %v339_v12 = vcvt.f32.s32 %v333_v63 }
 0x53f   :  { %v335_v5 = vsel %vm334_vm14, %v330_v4, inf }
 0x540   :  { %336 = vmin.xlane.f32.xlu1 %v335_v5  ;;  %v340_v18 = vshll.u32 %v339_v12, 16 }
 0x5c4   :  { %v323_v7 = vpop.xlane.xlu0 %322 }
 0x5c5   :  { %v324_v9 = vcvt.f32.s32 %v323_v7 }
 0x5c7   :  { %v327_v10 = vadd.s32 %v326_v8, %v324_v9 }
 0x5c9   :  { %vm342_vm15 = vcmp.eq.s32.totalorder %v312_v48, %v327_v10 }
 0x5ca   :  { %v344_v13 = vsel %vm342_vm15, 2147483647, %v312_v48 }
 0x5cb   :  { %v347_v15 = vshra.s32 %v344_v13, 16  ;;  %v346_v24 = vand.u32 65535, %v344_v13 }
 0x5cd   :  { %v337_v16 = vpop.xlane.xlu1 %336  ;;  %v349_v17 = vcvt.s32.f32 %v347_v15  ;;  %v348_v26 = vcvt.s32.f32 %v346_v24 }
 0x5ce   :  { %v338_v19 = vcvt.f32.s32 %v337_v16 }
 0x5cf   :  { %350 = vmin.xlane.f32.xlu0 %v349_v17 }
 0x5d0   :  { %v341_v20 = vadd.s32 %v340_v18, %v338_v19 }
 0x5d2   :  { %vm343_vm0 = vcmp.eq.s32.totalorder %v313_v55, %v341_v20 }
 0x5d3   :  { %v345_v21 = vsel %vm343_vm0, 2147483647, %v313_v55 }
 0x5d4   :  { %v361_v22 = vshra.s32 %v345_v21, 16  ;;  %v360_v28 = vand.u32 65535, %v345_v21 }
 0x5d6   :  { %v363_v23 = vcvt.s32.f32 %v361_v22  ;;  %v362_v30 = vcvt.s32.f32 %v360_v28 }
 0x5d8   :  { %364 = vmin.xlane.f32.xlu1 %v363_v23 }
 0x65c   :  { %v351_v25 = vpop.xlane.xlu0 %350 }
 0x65d   :  { %vm352_vm1 = vcmp.eq.f32.partialorder %v349_v17, %v351_v25  ;;  %v357_v33 = vcvt.f32.s32 %v351_v25 }
 0x65e   :  { %v353_v27 = vsel %vm352_vm1, %v348_v26, inf }
 0x65f   :  { %354 = vmin.xlane.f32.xlu0 %v353_v27  ;;  %v358_v35 = vshll.u32 %v357_v33, 16 }
 0x665   :  { %v365_v29 = vpop.xlane.xlu1 %364 }
 0x666   :  { %vm366_vm2 = vcmp.eq.f32.partialorder %v363_v23, %v365_v29  ;;  %v371_v38 = vcvt.f32.s32 %v365_v29 }
 0x667   :  { %v367_v32 = vsel %vm366_vm2, %v362_v30, inf }
 0x668   :  { %368 = vmin.xlane.f32.xlu1 %v367_v32  ;;  %v372_v44 = vshll.u32 %v371_v38, 16 }
 0x6ec   :  { %v355_v34 = vpop.xlane.xlu0 %354 }
 0x6ed   :  { %v356_v36 = vcvt.f32.s32 %v355_v34 }
 0x6ef   :  { %v359_v37 = vadd.s32 %v358_v35, %v356_v36 }
 0x6f1   :  { %vm374_vm3 = vcmp.eq.s32.totalorder %v344_v13, %v359_v37 }
 0x6f2   :  { %v376_v40 = vsel %vm374_vm3, 2147483647, %v344_v13 }
 0x6f3   :  { %v379_v41 = vshra.s32 %v376_v40, 16  ;;  %v378_v50 = vand.u32 65535, %v376_v40 }
 0x6f5   :  { %v369_v42 = vpop.xlane.xlu1 %368  ;;  %v381_v43 = vcvt.s32.f32 %v379_v41  ;;  %v380_v52 = vcvt.s32.f32 %v378_v50 }
 0x6f6   :  { %v370_v45 = vcvt.f32.s32 %v369_v42 }
 0x6f7   :  { %382 = vmin.xlane.f32.xlu0 %v381_v43 }
 0x6f8   :  { %v373_v46 = vadd.s32 %v372_v44, %v370_v45 }
 0x6fa   :  { %vm375_vm4 = vcmp.eq.s32.totalorder %v345_v21, %v373_v46 }
 0x6fb   :  { %v377_v47 = vsel %vm375_vm4, 2147483647, %v345_v21 }
 0x6fc   :  { %v393_v48 = vshra.s32 %v377_v47, 16  ;;  %v392_v54 = vand.u32 65535, %v377_v47 }
 0x6fe   :  { %v395_v49 = vcvt.s32.f32 %v393_v48  ;;  %v394_v56 = vcvt.s32.f32 %v392_v54  ;;  %v876_v54 = vmov 3  }
 0x700   :  { %396 = vmin.xlane.f32.xlu1 %v395_v49 }
 0x784   :  { %v383_v51 = vpop.xlane.xlu0 %382 }
 0x785   :  { %vm384_vm5 = vcmp.eq.f32.partialorder %v381_v43, %v383_v51  ;;  %v389_v58 = vcvt.f32.s32 %v383_v51 }
 0x786   :  { %v385_v53 = vsel %vm384_vm5, %v380_v52, inf }
 0x787   :  { %386 = vmin.xlane.f32.xlu0 %v385_v53  ;;  %v390_v60 = vshll.u32 %v389_v58, 16  ;;  %v875_v53 = vmov 2  }
 0x78d   :  { %v397_v55 = vpop.xlane.xlu1 %396 }
 0x78e   :  { %vm398_vm6 = vcmp.eq.f32.partialorder %v395_v49, %v397_v55  ;;  %v403_v63 = vcvt.f32.s32 %v397_v55 }
 0x78f   :  { %v399_v57 = vsel %vm398_vm6, %v394_v56, inf }
 0x790   :  { %400 = vmin.xlane.f32.xlu1 %v399_v57  ;;  %v404_v8 = vshll.u32 %v403_v63, 16 }
 0x814   :  { %v387_v59 = vpop.xlane.xlu0 %386 }
 0x815   :  { %v388_v61 = vcvt.f32.s32 %v387_v59 }
 0x817   :  { %v391_v62 = vadd.s32 %v390_v60, %v388_v61 }
 0x819   :  { %vm406_vm7 = vcmp.eq.s32.totalorder %v376_v40, %v391_v62 }
 0x81a   :  { %v408_v4 = vsel %vm406_vm7, 2147483647, %v376_v40 }
 0x81b   :  { %v411_v5 = vshra.s32 %v408_v4, 16  ;;  %v410_v16 = vand.u32 65535, %v408_v4 }
 0x81d   :  { %v401_v6 = vpop.xlane.xlu1 %400  ;;  %v413_v7 = vcvt.s32.f32 %v411_v5  ;;  %v412_v18 = vcvt.s32.f32 %v410_v16 }
 0x81e   :  { %v402_v9 = vcvt.f32.s32 %v401_v6 }
 0x81f   :  { %414 = vmin.xlane.f32.xlu0 %v413_v7 }
 0x820   :  { %v405_v10 = vadd.s32 %v404_v8, %v402_v9 }
 0x822   :  { %vm407_vm8 = vcmp.eq.s32.totalorder %v377_v47, %v405_v10 }
 0x823   :  { %v409_v12 = vsel %vm407_vm8, 2147483647, %v377_v47 }
 0x824   :  { %v425_v13 = vshra.s32 %v409_v12, 16  ;;  %v424_v20 = vand.u32 65535, %v409_v12 }
 0x826   :  { %v427_v15 = vcvt.s32.f32 %v425_v13  ;;  %v426_v22 = vcvt.s32.f32 %v424_v20 }
 0x828   :  { %428 = vmin.xlane.f32.xlu1 %v427_v15 }
 0x8ac   :  { %v415_v17 = vpop.xlane.xlu0 %414 }
 0x8ad   :  { %vm416_vm9 = vcmp.eq.f32.partialorder %v413_v7, %v415_v17  ;;  %v421_v24 = vcvt.f32.s32 %v415_v17 }
 0x8ae   :  { %v417_v19 = vsel %vm416_vm9, %v412_v18, inf  ;;  %vm610_vm9 = vcmask 679936  }
 0x8af   :  { %418 = vmin.xlane.f32.xlu0 %v417_v19  ;;  %v422_v26 = vshll.u32 %v421_v24, 16 }
 0x8b5   :  { %v429_v21 = vpop.xlane.xlu1 %428 }
 0x8b6   :  { %vm430_vm10 = vcmp.eq.f32.partialorder %v427_v15, %v429_v21  ;;  %v435_v29 = vcvt.f32.s32 %v429_v21 }
 0x8b7   :  { %v431_v23 = vsel %vm430_vm10, %v426_v22, inf }
 0x8b8   :  { %432 = vmin.xlane.f32.xlu1 %v431_v23  ;;  %v436_v35 = vshll.u32 %v435_v29, 16 }
 0x93c   :  { %v419_v25 = vpop.xlane.xlu0 %418 }
 0x93d   :  { %v420_v27 = vcvt.f32.s32 %v419_v25 }
 0x93f   :  { %v423_v28 = vadd.s32 %v422_v26, %v420_v27 }
 0x941   :  { %vm438_vm11 = vcmp.eq.s32.totalorder %v408_v4, %v423_v28 }
 0x942   :  { %v440_v30 = vsel %vm438_vm11, 2147483647, %v408_v4 }
 0x943   :  { %v443_v32 = vshra.s32 %v440_v30, 16  ;;  %v442_v42 = vand.u32 65535, %v440_v30 }
 0x945   :  { %v433_v33 = vpop.xlane.xlu1 %432  ;;  %v445_v34 = vcvt.s32.f32 %v443_v32  ;;  %v444_v44 = vcvt.s32.f32 %v442_v42  ;;  %v73_v32 = vsub.s32 1, %v945_v11 }
 0x946   :  { %v434_v36 = vcvt.f32.s32 %v433_v33  ;;  %v101_v33 = vsub.s32 3, %v945_v11 }
 0x947   :  { %446 = vmin.xlane.f32.xlu0 %v445_v34 }
 0x948   :  { %v437_v37 = vadd.s32 %v436_v35, %v434_v36  ;;  %v59_v35 = vsub.s32 0, %v945_v11 }
 0x94a   :  { %vm439_vm12 = vcmp.eq.s32.totalorder %v409_v12, %v437_v37  ;;  %v74_v37 = vrot.slane %v949_v14, %v73_v32 }
 0x94b   :  { %v441_v38 = vsel %vm439_vm12, 2147483647, %v409_v12 }
 0x94c   :  { %v457_v40 = vshra.s32 %v441_v38, 16  ;;  %v456_v46 = vand.u32 65535, %v441_v38 }
 0x94e   :  { %v459_v41 = vcvt.s32.f32 %v457_v40  ;;  %v458_v48 = vcvt.s32.f32 %v456_v46 }
 0x950   :  { %460 = vmin.xlane.f32.xlu1 %v459_v41 }
 0x95d   :  { %115 = vrot.lane.b32.xlu0 %v934_v2, %s873_s1 }
 0x9d4   :  { %v447_v43 = vpop.xlane.xlu0 %446 }
 0x9d5   :  { %vm448_vm13 = vcmp.eq.f32.partialorder %v445_v34, %v447_v43  ;;  %v453_v7 = vcvt.f32.s32 %v447_v43  ;;  %v87_v34 = vsub.s32 2, %v945_v11 }
 0x9d6   :  { %v449_v45 = vsel %vm448_vm13, %v444_v44, inf }
 0x9d7   :  { %450 = vmin.xlane.f32.xlu0 %v449_v45  ;;  %v454_v9 = vshll.u32 %v453_v7, 16  ;;  %v88_v40 = vrot.slane %v949_v14, %v87_v34 }
 0x9d8   :  { %v116_v50 = vpop.permute.xlu0 %115 }
 0x9d9   :  { %v121_v51 = vsub.f32 %v934_v2, %v116_v50 }
 0x9db   :  { %v123_v52 = vmax.f32 %v121_v51, 0.0 }
 0x9dd   :  { %v461_v47 = vpop.xlane.xlu1 %460 }
 0x9de   :  { %vm462_vm14 = vcmp.eq.f32.partialorder %v459_v41, %v461_v47  ;;  %v467_v55 = vcvt.f32.s32 %v461_v47  ;;  %v60_v41 = vrot.slane %v949_v14, %v59_v35  ;;  %v147_v47 = vsub.s32 6, %v945_v11 }
 0x9df   :  { %v463_v49 = vsel %vm462_vm14, %v458_v48, inf  ;;  %vm611_vm14 = vsmask.f32 512 }
 0x9e0   :  { %464 = vmin.xlane.f32.xlu1 %v463_v49  ;;  %v468_v57 = vshll.u32 %v467_v55, 16 }
 0x9ed   :  { %127 = vrot.lane.b32.xlu0 %v123_v52, %s874_s15 }
 0x9f1   :  { %117 = vrot.lane.b32.xlu1 %v937_v3, %s873_s1  ;;  %54 = vperm.xlu0 %720, %v937_v3  }
 0x9f5   :  { %722 = vset.pattern.permute.xlu0 %v875_v53 }
 0x9f6   :  { %78 = vperm.xlu0 %722, %v934_v2  }
 0x9fa   :  { %725 = vset.pattern.permute.xlu0 %v876_v54 }
 0xa64   :  { %v451_v6 = vpop.xlane.xlu0 %450 }
 0xa65   :  { %v452_v8 = vcvt.f32.s32 %v451_v6 }
 0xa67   :  { %v455_v10 = vadd.s32 %v454_v9, %v452_v8 }
 0xa68   :  { %v128_v16 = vpop.permute.xlu0 %127 }
 0xa69   :  { %vm470_vm0 = vcmp.eq.s32.totalorder %v440_v30, %v455_v10  ;;  %v133_v17 = vmul.f32 %v128_v16, %v123_v52 }
 0xa6a   :  { %v472_v12 = vsel %vm470_vm0, 2147483647, %v440_v30 }
 0xa6b   :  { %v475_v13 = vshra.s32 %v472_v12, 16  ;;  %v474_v25 = vand.u32 65535, %v472_v12 }
 0xa6d   :  { %v465_v56 = vpop.xlane.xlu1 %464  ;;  %v477_v15 = vcvt.s32.f32 %v475_v13  ;;  %v476_v26 = vcvt.s32.f32 %v474_v25 }
 0xa6e   :  { %v466_v58 = vcvt.f32.s32 %v465_v56 }
 0xa70   :  { %v469_v59 = vadd.s32 %v468_v57, %v466_v58  ;;  %v55_v20 = vpop.permute.xlu0 %54  ;;  %v148_v58 = vrot.slane %v949_v14, %v147_v47 }
 0xa71   :  { %v118_v60 = vpop.permute.xlu1 %117  ;;  %v62_v52 = vmax.f32 %v55_v20, %v60_v41 }
 0xa72   :  { %v122_v61 = vsub.f32 %v937_v3, %v118_v60  ;;  %vm471_vm15 = vcmp.eq.s32.totalorder %v441_v38, %v469_v59 }
 0xa73   :  { %v473_v62 = vsel %vm471_vm15, 2147483647, %v441_v38  ;;  %v102_v38 = vrot.slane %v949_v14, %v101_v33  ;;  %vm1008_vm15 = vmand %vm610_vm9, %vm611_vm14 }
 0xa74   :  { %v124_v63 = vmax.f32 %v122_v61, 0.0  ;;  %v489_v4 = vshra.s32 %v473_v62, 16  ;;  %v488_v22 = vand.u32 65535, %v473_v62 }
 0xa75   :  { %v79_v21 = vpop.permute.xlu0 %78 }
 0xa76   :  { %129 = vrot.lane.b32.xlu1 %v124_v63, %s874_s15  ;;  %v491_v5 = vcvt.s32.f32 %v489_v4  ;;  %v490_v23 = vcvt.s32.f32 %v488_v22  ;;  %v89_v46 = vmin.f32 %v79_v21, %v88_v40 }
 0xa78   :  { %492 = vmin.xlane.f32.xlu0 %v491_v5 }
 0xa8e   :  { %96 = vperm.xlu0 %725, %v937_v3  }
 0xa92   :  { %727 = vset.pattern.permute.xlu0 %v870_v0 }
 0xa9a   :  { %478 = vmin.xlane.f32.xlu1 %v477_v15 }
 0xaab   :  { %49 = vperm.xlu1 %719, %v934_v2  }
 0xaaf   :  { %721 = vset.pattern.permute.xlu1 %v870_v0 }
 0xab0   :  { %64 = vperm.xlu1 %721, %v934_v2  }
 0xab4   :  { %68 = vperm.xlu1 %721, %v937_v3  }
 0xab8   :  { %723 = vset.pattern.permute.xlu1 %v875_v53 }
 0xab9   :  { %82 = vperm.xlu1 %723, %v937_v3  }
 0xabd   :  { %724 = vset.pattern.permute.xlu1 %v876_v54 }
 0xabe   :  { %92 = vperm.xlu1 %724, %v934_v2  }
 0xac2   :  { %726 = vset.pattern.permute.xlu1 %v875_v53 }
 0xac3   :  { %137 = vperm.xlu1 %726, %v133_v17  }
 0xae8   :  { %v130_v18 = vpop.permute.xlu1 %129 }
 0xae9   :  { %v134_v19 = vmul.f32 %v130_v18, %v124_v63 }
 0xaeb   :  { %142 = vperm.xlu1 %726, %v134_v19  }
 0xb05   :  { %v493_v0 = vpop.xlane.xlu0 %492 }
 0xb06   :  { %vm494_vm1 = vcmp.eq.f32.partialorder %v491_v5, %v493_v0  ;;  %v499_v12 = vcvt.f32.s32 %v493_v0  ;;  %v877_v0 = vmov 0.0  }
 0xb07   :  { %v495_v24 = vsel %vm494_vm1, %v490_v23, inf }
 0xb08   :  { %v500_v14 = vshll.u32 %v499_v12, 16 }
 0xb0d   :  { %v97_v44 = vpop.permute.xlu0 %96 }
 0xb0e   :  { %v104_v50 = vmin.f32 %v97_v44, %v102_v38 }
 0xb0f   :  { %496 = vmin.xlane.f32.xlu1 %v495_v24 }
 0xb27   :  { %v479_v3 = vpop.xlane.xlu1 %478 }
 0xb28   :  { %vm480_vm2 = vcmp.eq.f32.partialorder %v477_v15, %v479_v3  ;;  %v485_v13 = vcvt.f32.s32 %v479_v3 }
 0xb29   :  { %v481_v27 = vsel %vm480_vm2, %v476_v26, inf }
 0xb2a   :  { %482 = vmin.xlane.f32.xlu0 %v481_v27  ;;  %v486_v19 = vshll.u32 %v485_v13, 16 }
 0xb2b   :  { %v50_v2 = vpop.permute.xlu1 %49 }
 0xb2c   :  { %v61_v45 = vmax.f32 %v50_v2, %v60_v41 }
 0xb2e   :  { %v105_v53 = vsub.f32 %v89_v46, %v61_v45 }
 0xb2f   :  { %v65_v28 = vpop.permute.xlu1 %64 }
 0xb30   :  { %v75_v42 = vmax.f32 %v65_v28, %v74_v37  ;;  %v107_v59 = vmax.f32 %v105_v53, 0.0 }
 0xb33   :  { %v69_v29 = vpop.permute.xlu1 %68 }
 0xb34   :  { %v76_v48 = vmax.f32 %v69_v29, %v74_v37 }
 0xb36   :  { %v110_v56 = vsub.f32 %v104_v50, %v76_v48 }
 0xb38   :  { %v83_v30 = vpop.permute.xlu1 %82  ;;  %v112_v62 = vmax.f32 %v110_v56, 0.0 }
 0xb39   :  { %v90_v49 = vmin.f32 %v83_v30, %v88_v40 }
 0xb3b   :  { %v106_v55 = vsub.f32 %v90_v49, %v62_v52 }
 0xb3d   :  { %v93_v36 = vpop.permute.xlu1 %92  ;;  %v108_v61 = vmax.f32 %v106_v55, 0.0 }
 0xb3e   :  { %v103_v43 = vmin.f32 %v93_v36, %v102_v38 }
 0xb3f   :  { %v114_v6 = vmul.f32 %v112_v62, %v108_v61 }
 0xb40   :  { %v109_v51 = vsub.f32 %v103_v43, %v75_v42 }
 0xb42   :  { %v138_v54 = vpop.permute.xlu1 %137  ;;  %v111_v57 = vmax.f32 %v109_v51, 0.0 }
 0xb43   :  { %v149_v4 = vadd.f32 %v148_v58, %v138_v54 }
 0xb44   :  { %v113_v63 = vmul.f32 %v111_v57, %v107_v59 }
 0xb46   :  { %v151_v11 = vsub.f32 %v149_v4, %v113_v63 }
 0xb48   :  { %v153_v8 = vadd.f32 1e-09, %v151_v11 }
 0xb4a   :  { %728 = vrcp.f32 %v153_v8 }
 0xb54   :  { %v729_v16 = vpop.eup %728 }
 0xb55   :  { %v989_v20 = vmul.f32 %v729_v16, %v113_v63 }
 0xb57   :  { %vm504_vm4 = vcmp.gt.f32.partialorder %v989_v20, 0.0 }
 0xb6a   :  { %v143_v60 = vpop.permute.xlu1 %142 }
 0xb6b   :  { %v150_v5 = vadd.f32 %v148_v58, %v143_v60 }
 0xb6d   :  { %v152_v7 = vsub.f32 %v150_v5, %v114_v6 }
 0xb6f   :  { %v154_v9 = vadd.f32 1e-09, %v152_v7 }
 0xb71   :  { %730 = vrcp.f32 %v154_v9 }
 0xb7b   :  { %v731_v17 = vpop.eup %730 }
 0xb7c   :  { %v991_v23 = vmul.f32 %v731_v17, %v114_v6 }
 0xb7e   :  { %vm505_vm7 = vcmp.gt.f32.partialorder %v991_v23, 0.0  ;;  %v637_v28 = vsel %vm610_vm9, %v991_v23, -inf }
 0xb9c   :  { %v497_v10 = vpop.xlane.xlu1 %496 }
 0xb9d   :  { %v498_v15 = vcvt.f32.s32 %v497_v10 }
 0xb9f   :  { %v501_v21 = vadd.s32 %v500_v14, %v498_v15 }
 0xba1   :  { %vm503_vm5 = vcmp.le.s32.totalorder %v956_v39, %v501_v21  ;;  %v634_v39 = vsel %vm610_vm9, %v989_v20, -inf }
 0xba2   :  { %vm507_vm8 = vmand %vm503_vm5, %vm505_vm7 }
 0xba3   :  { %v696_v27 = vsel %vm507_vm8, 1.0, %v877_v0 }
 0xbb7   :  { %v483_v18 = vpop.xlane.xlu0 %482 }
 0xbb8   :  { %v484_v22 = vcvt.f32.s32 %v483_v18 }
 0xbba   :  { %v487_v24 = vadd.s32 %v486_v19, %v484_v22 }
 0xbbc   :  { %vm502_vm3 = vcmp.le.s32.totalorder %v953_v31, %v487_v24  ;;  %v509_v31 = vsel %vm507_vm8, %v991_v23, 0.0 }
 0xbbd   :  { %vm506_vm6 = vmand %vm502_vm3, %vm504_vm4  ;;  %v515_v2 = vmul.f32 %v509_v31, %v509_v31 }
 0xbbe   :  { %v695_v25 = vsel %vm506_vm6, 1.0, %v877_v0  ;;  %v508_v3 = vsel %vm506_vm6, %v989_v20, 0.0 }
 0xbbf   :  { %524 = vadd.xlane.f32.xlu0 %v695_v25  ;;  %510 = vadd.xlane.f32.xlu1 %v508_v3  ;;  %v514_v26 = vmul.f32 %v508_v3, %v508_v3 }
 0xbc3   :  { %526 = vadd.xlane.f32.xlu0 %v696_v27  ;;  %516 = vadd.xlane.f32.xlu1 %v514_v26 }
 0xbc7   :  { %512 = vadd.xlane.f32.xlu0 %v509_v31  ;;  %635 = vmax.xlane.f32.xlu1 %v634_v39 }
 0xbcb   :  { %518 = vadd.xlane.f32.xlu0 %v515_v2 }
 0xbcf   :  { %638 = vmax.xlane.f32.xlu0 %v637_v28 }
 0xc4c   :  { %v525_v29 = vpop.xlane.xlu0 %524  ;;  %v511_v30 = vpop.xlane.xlu1 %510 }
 0xc4d   :  { %v552_v32 = vrot.slane %v525_v29, 4  ;;  %v528_v33 = vrot.slane %v511_v30, 4 }
 0xc4f   :  { %v553_v34 = vadd.f32 %v552_v32, %v525_v29  ;;  %v529_v35 = vadd.f32 %v528_v33, %v511_v30 }
 0xc50   :  { %v527_v36 = vpop.xlane.xlu0 %526  ;;  %v517_v37 = vpop.xlane.xlu1 %516 }
 0xc51   :  { %v554_v38 = vrot.slane %v553_v34, 2  ;;  %v558_v40 = vrot.slane %v527_v36, 4  ;;  %v540_v41 = vrot.slane %v517_v37, 4  ;;  %v530_v42 = vrot.slane %v529_v35, 2 }
 0xc53   :  { %v555_v43 = vadd.f32 %v554_v38, %v553_v34  ;;  %v559_v44 = vadd.f32 %v558_v40, %v527_v36  ;;  %v541_v45 = vadd.f32 %v540_v41, %v517_v37  ;;  %v531_v50 = vadd.f32 %v530_v42, %v529_v35 }
 0xc54   :  { %v513_v46 = vpop.xlane.xlu0 %512  ;;  %v636_v47 = vpop.xlane.xlu1 %635 }
 0xc55   :  { %v556_v48 = vrot.slane %v555_v43, 1  ;;  %v560_v49 = vrot.slane %v559_v44, 2  ;;  %v534_v51 = vrot.slane %v513_v46, 4  ;;  %732 = vrcp.f32 %v636_v47 }
 0xc56   :  { %v542_v54 = vrot.slane %v541_v45, 2  ;;  %v532_v58 = vrot.slane %v531_v50, 1 }
 0xc57   :  { %v557_v52 = vadd.f32 %v556_v48, %v555_v43  ;;  %v561_v53 = vadd.f32 %v560_v49, %v559_v44  ;;  %v535_v55 = vadd.f32 %v534_v51, %v513_v46  ;;  %v627_v49 = vld [vmem:[#allocation8] sm:$0x1] }
 0xc58   :  { %v519_v56 = vpop.xlane.xlu0 %518  ;;  %v543_v62 = vadd.f32 %v542_v54, %v541_v45  ;;  %v533_v6 = vadd.f32 %v532_v58, %v531_v50  ;;  %v616_v58 = vld [vmem:[#allocation7 + $0x1] sm:$0x1] }
 0xc59   :  { %734 = vrcp.f32 %v557_v52  ;;  %v697_v57 = vadd.f32 -1.0, %v557_v52  ;;  %v562_v59 = vrot.slane %v561_v53, 1  ;;  %v536_v60 = vrot.slane %v535_v55, 2 }
 0xc5a   :  { %v546_v61 = vrot.slane %v519_v56, 4  ;;  %v544_v12 = vrot.slane %v543_v62, 1  ;;  %v568_v16 = vmul.f32 %v533_v6, %v533_v6  ;;  %vm582_vm10 = vcmp.gt.f32.partialorder %v557_v52, 1.5 }
 0xc5b   :  { %736 = vrcp.f32 %v697_v57  ;;  %v563_v63 = vadd.f32 %v562_v59, %v561_v53  ;;  %v537_v4 = vadd.f32 %v536_v60, %v535_v55  ;;  %v613_v53 = vld [vmem:[#allocation7] sm:$0x1]  ;;  %v630_v55 = vld [vmem:[#allocation8 + $0x1] sm:$0x1] }
 0xc5c   :  { %v547_v5 = vadd.f32 %v546_v61, %v519_v56  ;;  %v639_v11 = vpop.xlane.xlu0 %638  ;;  %v545_v19 = vadd.f32 %v544_v12, %v543_v62 }
 0xc5d   :  { %738 = vrcp.f32 %v639_v11  ;;  %v698_v7 = vadd.f32 -1.0, %v563_v63  ;;  %v538_v8 = vrot.slane %v537_v4, 1  ;;  %vm583_vm11 = vcmp.gt.f32.partialorder %v563_v63, 1.5 }
 0xc5e   :  { %740 = vrcp.f32 %v563_v63  ;;  %v548_v9 = vrot.slane %v547_v5, 2 }
 0xc5f   :  { %v733_v10 = vpop.eup %732  ;;  %742 = vrcp.f32 %v698_v7  ;;  %v539_v17 = vadd.f32 %v538_v8, %v537_v4 }
 0xc60   :  { %v641_v13 = vmul.f32 %v733_v10, %v989_v20  ;;  %v549_v15 = vadd.f32 %v548_v9, %v547_v5 }
 0xc61   :  { %v569_v25 = vmul.f32 %v539_v17, %v539_v17 }
 0xc62   :  { %644 = vst.msk [vmem:[#allocation10] sm:$0x1] %vm610_vm9, %v641_v13  ;;  %v550_v21 = vrot.slane %v549_v15, 1 }
 0xc63   :  { %v735_v14 = vpop.eup %734 }
 0xc64   :  { %v570_v18 = vmul.f32 %v735_v14, %v568_v16  ;;  %v551_v39 = vadd.f32 %v550_v21, %v549_v15  ;;  %v565_v38 = vmul.f32 %v735_v14, %v533_v6 }
 0xc65   :  { %v737_v22 = vpop.eup %736 }
 0xc66   :  { %v572_v24 = vsub.f32 %v545_v19, %v570_v18 }
 0xc67   :  { %v739_v0 = vpop.eup %738 }
 0xc68   :  { %v741_v3 = vpop.eup %740  ;;  %v577_v26 = vmul.f32 %v737_v22, %v572_v24  ;;  %v643_v27 = vmul.f32 %v739_v0, %v991_v23 }
 0xc69   :  { %v571_v31 = vmul.f32 %v741_v3, %v569_v25  ;;  %v743_v29 = vpop.eup %742  ;;  %v567_v47 = vmul.f32 %v741_v3, %v539_v17 }
 0xc6a   :  { %v580_v2 = vmax.f32 %v577_v26, 0.0  ;;  %645 = vst.msk [vmem:[#allocation10 + $0x1] sm:$0x1] %vm610_vm9, %v643_v27 }
 0xc6b   :  { %v573_v28 = vsub.f32 %v551_v39, %v571_v31 }
 0xc6c   :  { %v584_v30 = vsel %vm582_vm10, %v580_v2, nan }
 0xc6d   :  { %744 = vrsqrt.f32 %v584_v30  ;;  %v579_v32 = vmul.f32 %v743_v29, %v573_v28  ;;  %vm588_vm12 = vcmp.eq.f32.partialorder %v584_v30, inf  ;;  %v591_v37 = vand.u32 2147483648, %v584_v30 }
 0xc6e   :  { %vm590_vm13 = vcmp.eq.f32.partialorder %v584_v30, 0.0 }
 0xc6f   :  { %v581_v33 = vmax.f32 %v579_v32, 0.0 }
 0xc71   :  { %v585_v34 = vsel %vm583_vm11, %v581_v33, nan }
 0xc72   :  { %746 = vrsqrt.f32 %v585_v34  ;;  %vm595_vm0 = vcmp.eq.f32.partialorder %v585_v34, inf  ;;  %v598_v46 = vand.u32 2147483648, %v585_v34  ;;  %vm597_vm3 = vcmp.eq.f32.partialorder %v585_v34, 0.0 }
 0xc77   :  { %v745_v35 = vpop.eup %744 }
 0xc78   :  { %v587_v36 = vmul.f32 %v745_v35, %v584_v30 }
 0xc7a   :  { %v589_v40 = vsel %vm588_vm12, %v584_v30, %v587_v36 }
 0xc7b   :  { %v592_v41 = vsel %vm590_vm13, %v591_v37, %v589_v40 }
 0xc7c   :  { %v747_v42 = vpop.eup %746  ;;  %v600_v43 = vadd.f32 %v592_v41, %v565_v38 }
 0xc7d   :  { %v594_v44 = vmul.f32 %v747_v42, %v585_v34 }
 0xc7e   :  { %vm619_vm1 = vcmp.lt.f32.partialorder %v989_v20, %v600_v43  ;;  %vm602_vm2 = vcmp.gt.f32.partialorder %v989_v20, %v600_v43 }
 0xc7f   :  { %v596_v48 = vsel %vm595_vm0, %v585_v34, %v594_v44  ;;  %vm621_vm4 = vmpackc.low %vm619_vm1, %vm619_vm1 }
 0xc80   :  { %v599_v50 = vsel %vm597_vm3, %v598_v46, %v596_v48  ;;  %vm622_vm5 = vmpackc.even %vm621_vm4, %vm621_vm4 }
 0xc81   :  { %v601_v51 = vadd.f32 %v599_v50, %v567_v47  ;;  %v625_v52 = vsel %vm622_vm5, 16843009, %v871_v1  ;;  %vm604_vm6 = vmpackc.low %vm602_vm2, %vm602_vm2 }
 0xc82   :  { %v628_v54 = vsel %vm1008_vm15, %v625_v52, %v627_v49  ;;  %vm605_vm7 = vmpackc.even %vm604_vm6, %vm604_vm6 }
 0xc83   :  { %vm620_vm8 = vcmp.lt.f32.partialorder %v991_v23, %v601_v51  ;;  %629 = vst [vmem:[#allocation8] sm:$0x1] %v628_v54  ;;  %vm603_vm9 = vcmp.gt.f32.partialorder %v991_v23, %v601_v51  ;;  %v608_v20 = vsel %vm605_vm7, 16843009, %v871_v1 }
 0xc84   :  { %vm623_vm10 = vmpackc.low %vm620_vm8, %vm620_vm8  ;;  %v614_v56 = vsel %vm1008_vm15, %v608_v20, %v613_v53 }
 0xc85   :  { %vm624_vm11 = vmpackc.even %vm623_vm10, %vm623_vm10  ;;  %615 = vst [vmem:[#allocation7] sm:$0x1] %v614_v56 }
 0xc86   :  { %v626_v57 = vsel %vm624_vm11, 16843009, %v871_v1  ;;  %vm606_vm12 = vmpackc.low %vm603_vm9, %vm603_vm9 }
 0xc87   :  { %v631_v23 = vsel %vm1008_vm15, %v626_v57, %v630_v55  ;;  %vm607_vm13 = vmpackc.even %vm606_vm12, %vm606_vm12 }
 0xc88   :  { %632 = vst [vmem:[#allocation8 + $0x1] sm:$0x1] %v631_v23  ;;  %v609_v59 = vsel %vm607_vm13, 16843009, %v871_v1 }
 0xc89   :  { %803 = shalt.err (!%p800_p6)
}
 0xc8a   :  { %s804_s25 = scalar_lea.hbm %s1090_s3, 32 }
 0xc8b   :  { %p805_p7 = scmp.ne.s32.totalorder %s1090_s3, %s804_s25  ;;  %p808_p8 = scmp.lt.u32.totalorder %s804_s25, %s1090_s3 }
 0xc8d   :  { %p810_p9 = pnand %p808_p8, %p805_p7 }
 0xc8f   :  { %813 = shalt.err (!%p810_p9)
}
 0xc90   :  { %s881_s30 = smov 16   ;;  %s882_s5 = smov 1   ;;  %v617_v1 = vsel %vm1008_vm15, %v609_v59, %v616_v58 }
 0xc91   :  { %669 = dma.vmem_to_hbm [thread:$0]  %s664_s17, 32, %s1090_s3, [#allocation9], %s881_s30, %s881_s30, %s882_s5   ;;  %618 = vst [vmem:[#allocation7 + $0x1] sm:$0x1] %v617_v1 }
 0xc92   :  { %s814_s8 = scalar_lea.vmem %s1025_s19, 32  ;;  %p819_p11 = scmp.lt.s32.totalorder %s1025_s19, %s1025_s19 }
 0xc93   :  { %p815_p10 = scmp.ne.s32.totalorder %s1025_s19, %s814_s8  ;;  %p820_p12 = scmp.lt.s32.totalorder %s814_s8, %s814_s8 }
 0xc95   :  { %p821_p13 = por %p820_p12, %p819_p11 }
 0xc97   :  { %p822_p0 = pnand %p821_p13, %p815_p10 }
 0xc99   :  { %825 = shalt.err (!%p822_p0)
}
 0xc9a   :  { %s826_s11 = scalar_lea.hbm %s1091_s4, 32 }
 0xc9b   :  { %p827_p1 = scmp.ne.s32.totalorder %s1091_s4, %s826_s11  ;;  %p830_p2 = scmp.lt.u32.totalorder %s826_s11, %s1091_s4 }
 0xc9d   :  { %p832_p3 = pnand %p830_p2, %p827_p1 }
 0xc9f   :  { %835 = shalt.err (!%p832_p3)
}
 0xca0   :  { %681 = dma.vmem_to_hbm [thread:$0]  %s1025_s19, 32, %s1091_s4, [#allocation9], %s881_s30, %s881_s30, %s882_s5  }
 0xca1   :  { %s836_s15 = scalar_lea.vmem %s1028_s21, 32  ;;  %p841_p5 = scmp.lt.s32.totalorder %s1028_s21, %s1028_s21 }
 0xca2   :  { %p837_p4 = scmp.ne.s32.totalorder %s1028_s21, %s836_s15  ;;  %p842_p6 = scmp.lt.s32.totalorder %s836_s15, %s836_s15 }
 0xca4   :  { %p843_p7 = por %p842_p6, %p841_p5 }
 0xca6   :  { %p844_p8 = pnand %p843_p7, %p837_p4 }
 0xca8   :  { %847 = shalt.err (!%p844_p8)
}
 0xca9   :  { %s848_s18 = scalar_lea.hbm %s1089_s2, 32 }
 0xcaa   :  { %p849_p9 = scmp.ne.s32.totalorder %s1089_s2, %s848_s18  ;;  %p852_p10 = scmp.lt.u32.totalorder %s848_s18, %s1089_s2 }
 0xcac   :  { %p854_p11 = pnand %p852_p10, %p849_p9 }
 0xcae   :  { %857 = shalt.err (!%p854_p11)
}
 0xcaf   :  { %657 = dma.vmem_to_hbm [thread:$0]  %s1028_s21, 32, %s1089_s2, [#allocation4], %s881_s30, %s881_s30, %s882_s5  }
 0xcb0   :  { %862 = dma.done.wait [#allocation4], 32  }
 0xcb1   :  { %863 = vsyncadd [#allocation4], 4294967264 }
 0xcb2   :  { %864 = dma.done.wait [#allocation9], 64  }
 0xcb3   :  { %865 = vsyncadd [#allocation9], 4294967232 }
 0xcb4   :  { %691 = vsyncpa [#allocation3], 1 }
 0xcb5   :  { %692 = vsyncpa [#allocation6], 1 }
 0xcb6   :  { %693 = vsyncpa [#allocation4], 1 }
 0xcb7   :  { %694 = vsyncpa [#allocation9], 1 }

</bundles_post_ra>
